<compile_context>
chip_gen: v6e
topology: v6e:2x2x1
jax: 0.10.0
libtpu: 0.0.40
codegen_flags: <defaults>
</compile_context>

<pallas_src>
import functools
import math

import jax
import jax.numpy as jnp
from jax.experimental import pallas as pl
from jax.experimental.pallas import tpu as pltpu

HID_DIM = 32
N_HEADS = 4
HEAD_DIM = HID_DIM // N_HEADS
PF_DIM = 64
SEQ = 8            # trg (gene) sequence length
SEQ_SRC = 8        # enc_src sequence length
BATCH = 2
LANES = 128
LN_EPS = 1e-5      # PyTorch nn.LayerNorm default

assert 4 * HID_DIM == LANES, "fused trg projection assumes 4 * hid_dim == 128 lanes"


# ---------------------------------------------------------------------------
# In-kernel helpers
# ---------------------------------------------------------------------------
def _layer_norm(x, gamma, beta):
    mean = jnp.mean(x, axis=-1, keepdims=True)
    var = jnp.mean((x - mean) ** 2, axis=-1, keepdims=True)
    return (x - mean) * jax.lax.rsqrt(var + LN_EPS) * gamma + beta


def _softmax(e):
    m = jnp.max(e, axis=-1, keepdims=True)
    p = jnp.exp(e - m)
    return p / jnp.sum(p, axis=-1, keepdims=True)


# ---------------------------------------------------------------------------
# Pallas kernel: `batch_block` batch elements per grid step
#   trg_ref   : [BB*Lq, H]     enc_ref   : [BB*Lk, H]
#   sbias_ref : [BB*Lq, Lk]    tbias_ref : [BB*Lq, Lq]   (additive mask biases)
#   wmat_ref  : [224, 128]     bvec_ref  : [8, 128]      (packed params)
#   out_ref   : [BB*Lq, H]
# ---------------------------------------------------------------------------
def _dga_kernel(trg_ref, enc_ref, sbias_ref, tbias_ref, wmat_ref, bvec_ref, out_ref,
                *, batch_block, seq_q, seq_k):
    BB, Lq, Lk = batch_block, seq_q, seq_k
    H, D, NH = HID_DIM, HEAD_DIM, N_HEADS
    inv_scale = 1.0 / math.sqrt(D)

    trg = trg_ref[...]                                   # [BB*Lq, H]
    enc = enc_ref[...]                                   # [BB*Lk, H]

    # ---- fused Q/K/V projections (wide matmuls, MXU) ----------------------
    w_trg = wmat_ref[0:H, :]                             # [H,128] = [Qe | Qs | Ks | Vs]
    w_enc = wmat_ref[H:2 * H, :]                         # [H,128] = [Ke | Ve | 0 | 0]
    p_trg = jnp.dot(trg, w_trg, preferred_element_type=jnp.float32) + bvec_ref[0:1, :]
    p_enc = jnp.dot(enc, w_enc, preferred_element_type=jnp.float32) + bvec_ref[1:2, :]

    dn = (((1,), (1,)), ((), ()))                        # contract last dims (q @ k^T)

    fused_rows = []
    for b in range(BB):                                  # static unroll over batch block
        pt = p_trg[b * Lq:(b + 1) * Lq, :]               # [Lq, 128]
        pe = p_enc[b * Lk:(b + 1) * Lk, :]               # [Lk, 128]
        sb = sbias_ref[b * Lq:(b + 1) * Lq, :]           # [Lq, Lk]
        tb = tbias_ref[b * Lq:(b + 1) * Lq, :]           # [Lq, Lq]

        acc = jnp.zeros((Lq, LANES), jnp.float32)        # only lanes 0:H are meaningful
        for h in range(NH):                              # static unroll over heads
            qe = pt[:, 0 * H + h * D:0 * H + (h + 1) * D]
            qs = pt[:, 1 * H + h * D:1 * H + (h + 1) * D]
            ks = pt[:, 2 * H + h * D:2 * H + (h + 1) * D]
            vs = pt[:, 3 * H + h * D:3 * H + (h + 1) * D]
            ke = pe[:, 0 * H + h * D:0 * H + (h + 1) * D]
            ve = pe[:, 1 * H + h * D:1 * H + (h + 1) * D]

            e1 = jax.lax.dot_general(qe, ke, dn, preferred_element_type=jnp.float32)
            e1 = e1 * inv_scale + sb                     # [Lq, Lk]
            e2 = jax.lax.dot_general(qs, ks, dn, preferred_element_type=jnp.float32)
            e2 = e2 * inv_scale + tb                     # [Lq, Lq]
            a1 = _softmax(e1)
            a2 = _softmax(e2)

            ctx1 = jnp.dot(a1, ve, preferred_element_type=jnp.float32)   # [Lq, D]
            ctx2 = jnp.dot(a2, vs, preferred_element_type=jnp.float32)   # [Lq, D]

            m1h = wmat_ref[2 * H + h * D:2 * H + (h + 1) * D, :]         # [D,128], lanes 0:H live
            m2h = wmat_ref[3 * H + h * D:3 * H + (h + 1) * D, :]
            acc = acc + jnp.dot(ctx1, m1h, preferred_element_type=jnp.float32) \
                      + jnp.dot(ctx2, m2h, preferred_element_type=jnp.float32)
        fused_rows.append(acc)

    acc_all = fused_rows[0] if BB == 1 else jnp.concatenate(fused_rows, axis=0)  # [BB*Lq, 128]

    # ---- fc(cat(.,.)) + relu  (fc_o / fc already folded into M1/M2/b_fused) ----
    b_fused = bvec_ref[2:3, 0:H]
    fused = jnp.maximum(acc_all[:, 0:H] + b_fused, 0.0)  # [BB*Lq, H]

    gamma = bvec_ref[3:4, 0:H]
    beta = bvec_ref[4:5, 0:H]

    # residual + LayerNorm (dropout = identity)
    x = _layer_norm(trg + fused, gamma, beta)

    # position-wise feedforward
    w1 = wmat_ref[4 * H:5 * H, 0:PF_DIM]                 # [H, PF]
    b1 = bvec_ref[5:6, 0:PF_DIM]
    w2 = wmat_ref[5 * H:5 * H + PF_DIM, 0:H]             # [PF, H]
    b2 = bvec_ref[6:7, 0:H]
    hmid = jnp.maximum(jnp.dot(x, w1, preferred_element_type=jnp.float32) + b1, 0.0)
    ff = jnp.dot(hmid, w2, preferred_element_type=jnp.float32) + b2

    # residual + (same) LayerNorm
    out_ref[...] = _layer_norm(x + ff, gamma, beta)


# ---------------------------------------------------------------------------
# Parameter handling (weights stored as [in, out] so y = x @ W + b)
# ---------------------------------------------------------------------------
PARAM_SPECS = [
    ("eq_w", (HID_DIM, HID_DIM)), ("eq_b", (HID_DIM,)),      # encoder_attention fc_q/k/v/o
    ("ek_w", (HID_DIM, HID_DIM)), ("ek_b", (HID_DIM,)),
    ("ev_w", (HID_DIM, HID_DIM)), ("ev_b", (HID_DIM,)),
    ("eo_w", (HID_DIM, HID_DIM)), ("eo_b", (HID_DIM,)),
    ("sq_w", (HID_DIM, HID_DIM)), ("sq_b", (HID_DIM,)),      # self_attention fc_q/k/v/o
    ("sk_w", (HID_DIM, HID_DIM)), ("sk_b", (HID_DIM,)),
    ("sv_w", (HID_DIM, HID_DIM)), ("sv_b", (HID_DIM,)),
    ("so_w", (HID_DIM, HID_DIM)), ("so_b", (HID_DIM,)),
    ("fc_w", (2 * HID_DIM, HID_DIM)), ("fc_b", (HID_DIM,)),  # fc after cat
    ("ln_g", (HID_DIM,)), ("ln_b", (HID_DIM,)),              # single shared LayerNorm
    ("w1", (HID_DIM, PF_DIM)), ("b1", (PF_DIM,)),            # positionwise feedforward
    ("w2", (PF_DIM, HID_DIM)), ("b2", (HID_DIM,)),
]


def init_params(key):
    keys = jax.random.split(key, len(PARAM_SPECS))
    params = {}
    for (name, shape), k in zip(PARAM_SPECS, keys):
        if name == "ln_g":
            params[name] = (1.0 + 0.1 * jax.random.normal(k, shape)).astype(jnp.float32)
        else:
            params[name] = (0.05 * jax.random.normal(k, shape)).astype(jnp.float32)
    return params


def _pack_params(p):
    """Pack all weights into one [224,128] slab and all vectors into one [8,128] slab."""
    hi = jax.lax.Precision.HIGHEST
    H = HID_DIM

    wfc_top = p["fc_w"][:H, :]          # applies to _trg_enc (first half of the cat)
    wfc_bot = p["fc_w"][H:, :]          # applies to _trg_dec

    w_trg = jnp.concatenate([p["eq_w"], p["sq_w"], p["sk_w"], p["sv_w"]], axis=1)   # [H, 128]
    b_trg = jnp.concatenate([p["eq_b"], p["sq_b"], p["sk_b"], p["sv_b"]], axis=0)   # [128]
    w_enc = jnp.concatenate([p["ek_w"], p["ev_w"]], axis=1)                          # [H, 64]
    b_enc = jnp.concatenate([p["ek_b"], p["ev_b"]], axis=0)                          # [64]

    m1 = jnp.dot(p["eo_w"], wfc_top, precision=hi)                                   # [H, H]
    m2 = jnp.dot(p["so_w"], wfc_bot, precision=hi)                                   # [H, H]
    b_fused = (p["fc_b"]
               + jnp.dot(p["eo_b"], wfc_top, precision=hi)
               + jnp.dot(p["so_b"], wfc_bot, precision=hi))                          # [H]

    def padw(w):
        return jnp.pad(w, ((0, 0), (0, LANES - w.shape[1])))

    def padv(v):
        return jnp.pad(v, (0, LANES - v.shape[0]))[None, :]

    wmat = jnp.concatenate([
        w_trg,              # rows   0: 32  [Qe|Qs|Ks|Vs]
        padw(w_enc),        # rows  32: 64  [Ke|Ve|0|0]
        padw(m1),           # rows  64: 96  fc_o(enc) folded into fc  (per-head sublane slabs)
        padw(m2),           # rows  96:128  fc_o(self) folded into fc
        padw(p["w1"]),      # rows 128:160  FFN fc_1
        padw(p["w2"]),      # rows 160:224  FFN fc_2
    ], axis=0).astype(jnp.float32)                                                   # [224, 128]

    bvec = jnp.concatenate([
        padv(b_trg),        # row 0
        padv(b_enc),        # row 1
        padv(b_fused),      # row 2
        padv(p["ln_g"]),    # row 3
        padv(p["ln_b"]),    # row 4
        padv(p["b1"]),      # row 5
        padv(p["b2"]),      # row 6
        jnp.zeros((1, LANES), jnp.float32),  # row 7 (pad to 8 sublanes)
    ], axis=0).astype(jnp.float32)                                                   # [8, 128]
    return wmat, bvec


def _mask_to_bias(mask, batch, lq, lk):
    """[B,1,1,Lk]-broadcastable 0/1 mask -> dense additive bias [B*Lq, Lk]."""
    m = jnp.broadcast_to(mask.astype(jnp.float32), (batch, 1, lq, lk))[:, 0]
    bias = jnp.where(m == 0, jnp.float32(-1e10), jnp.float32(0.0))
    return bias.reshape(batch * lq, lk)


def _default_batch_block(batch):
    """v4/v5p/v7x (2 TC/chip): per-batch parallel grid steps.  v5e/v6e (1 TC): collapse batch."""
    try:
        kind = jax.devices()[0].device_kind.lower()
    except Exception:
        kind = ""
    multi_core = any(tag in kind for tag in ("v7", "7x", "v4", "v5p"))
    return 1 if (multi_core and batch > 1) else batch


# ---------------------------------------------------------------------------
# Wrapper
# ---------------------------------------------------------------------------
def drug_gene_attention_layer(trg, enc_src, trg_mask, src_mask, params, batch_block=None):
    if enc_src.ndim == 2:                      # enc_src.unsqueeze(1): [B,H] -> [B,1,H]
        enc_src = enc_src[:, None, :]
    B, Lq, H = trg.shape
    Lk = enc_src.shape[1]
    assert H == HID_DIM

    BB = _default_batch_block(B) if batch_block is None else batch_block
    assert B % BB == 0

    wmat, bvec = _pack_params(params)
    sbias = _mask_to_bias(src_mask, B, Lq, Lk)            # [B*Lq, Lk]
    tbias = _mask_to_bias(trg_mask, B, Lq, Lq)            # [B*Lq, Lq]

    trg2 = trg.reshape(B * Lq, H).astype(jnp.float32)
    enc2 = enc_src.reshape(B * Lk, H).astype(jnp.float32)

    kernel = functools.partial(_dga_kernel, batch_block=BB, seq_q=Lq, seq_k=Lk)

    out2 = pl.pallas_call(
        kernel,
        out_shape=jax.ShapeDtypeStruct((B * Lq, H), jnp.float32),
        grid=(B // BB,),
        in_specs=[
            pl.BlockSpec((BB * Lq, H), lambda b: (b, 0)),     # trg
            pl.BlockSpec((BB * Lk, H), lambda b: (b, 0)),     # enc_src
            pl.BlockSpec((BB * Lq, Lk), lambda b: (b, 0)),    # src additive mask bias
            pl.BlockSpec((BB * Lq, Lq), lambda b: (b, 0)),    # trg additive mask bias
            pl.BlockSpec(wmat.shape, lambda b: (0, 0)),       # packed weights (constant)
            pl.BlockSpec(bvec.shape, lambda b: (0, 0)),       # packed biases  (constant)
        ],
        out_specs=pl.BlockSpec((BB * Lq, H), lambda b: (b, 0)),
        compiler_params=pltpu.CompilerParams(dimension_semantics=("parallel",)),
    )(trg2, enc2, sbias, tbias, wmat, bvec)

    return out2.reshape(B, Lq, H), None        # module returns (trg, None)


# ---------------------------------------------------------------------------
# Pure-JAX reference with PyTorch semantics (for the correctness check)
# ---------------------------------------------------------------------------
def reference(trg, enc_src, trg_mask, src_mask, p):
    enc = enc_src if enc_src.ndim == 3 else enc_src[:, None, :]
    hi = jax.lax.Precision.HIGHEST

    def mha(q, k, v, mask, wq, bq, wk, bk, wv, bv, wo, bo):
        B, Lq, H = q.shape
        Lk = k.shape[1]
        Q = (jnp.dot(q, wq, precision=hi) + bq).reshape(B, Lq, N_HEADS, HEAD_DIM).transpose(0, 2, 1, 3)
        K = (jnp.dot(k, wk, precision=hi) + bk).reshape(B, Lk, N_HEADS, HEAD_DIM).transpose(0, 2, 1, 3)
        V = (jnp.dot(v, wv, precision=hi) + bv).reshape(B, Lk, N_HEADS, HEAD_DIM).transpose(0, 2, 1, 3)
        energy = jnp.einsum("bhqd,bhkd->bhqk", Q, K, precision=hi) / jnp.sqrt(jnp.float32(HEAD_DIM))
        mask4 = jnp.broadcast_to(mask.astype(jnp.float32), energy.shape)
        energy = jnp.where(mask4 == 0, jnp.float32(-1e10), energy)
        attn = jax.nn.softmax(energy, axis=-1)
        x = jnp.einsum("bhqk,bhkd->bhqd", attn, V, precision=hi)
        x = x.transpose(0, 2, 1, 3).reshape(B, Lq, H)
        return jnp.dot(x, wo, precision=hi) + bo

    def ln(x):
        mu = jnp.mean(x, axis=-1, keepdims=True)
        var = jnp.mean((x - mu) ** 2, axis=-1, keepdims=True)
        return (x - mu) * jax.lax.rsqrt(var + LN_EPS) * p["ln_g"] + p["ln_b"]

    t_enc = mha(trg, enc, enc, src_mask,
                p["eq_w"], p["eq_b"], p["ek_w"], p["ek_b"],
                p["ev_w"], p["ev_b"], p["eo_w"], p["eo_b"])
    t_dec = mha(trg, trg, trg, trg_mask,
                p["sq_w"], p["sq_b"], p["sk_w"], p["sk_b"],
                p["sv_w"], p["sv_b"], p["so_w"], p["so_b"])
    _trg = jax.nn.relu(jnp.dot(jnp.concatenate([t_enc, t_dec], axis=2), p["fc_w"], precision=hi)
                       + p["fc_b"])
    x = ln(trg + _trg)
    ff = jnp.dot(jax.nn.relu(jnp.dot(x, p["w1"], precision=hi) + p["b1"]), p["w2"], precision=hi) + p["b2"]
    return ln(x + ff)


if __name__ == "__main__":
    key = jax.random.PRNGKey(0)
    k_trg, k_enc, k_par = jax.random.split(key, 3)

    trg = jax.random.normal(k_trg, (BATCH, SEQ, HID_DIM), dtype=jnp.float32)
    enc_src = jax.random.normal(k_enc, (BATCH, SEQ_SRC, HID_DIM), dtype=jnp.float32)

    # padding masks [B, 1, 1, L]: batch 0 fully valid, batch 1 has trailing pad
    src_mask = jnp.ones((BATCH, 1, 1, SEQ_SRC), jnp.float32).at[1, 0, 0, -3:].set(0.0)
    trg_mask = jnp.ones((BATCH, 1, 1, SEQ), jnp.float32).at[1, 0, 0, -1:].set(0.0)

    params = init_params(k_par)

    out, _ = drug_gene_attention_layer(trg, enc_src, trg_mask, src_mask, params)
    out = jax.block_until_ready(out)

    ref = reference(trg, enc_src, trg_mask, src_mask, params)
    assert out.shape == (BATCH, SEQ, HID_DIM)
    max_err = float(jnp.max(jnp.abs(out - ref)))
    assert jnp.allclose(out, ref, atol=5e-4, rtol=5e-4), f"max_err={max_err}"

    print("KERNEL_OK")
</pallas_src>

<mosaic_0001>
module attributes {stable_mosaic.version = 11 : i64} {
  func.func @_dga_kernel(%arg0: i32, %arg1: memref<16x32xf32, #tpu.memory_space<vmem>>, %arg2: memref<16x32xf32, #tpu.memory_space<vmem>>, %arg3: memref<16x8xf32, #tpu.memory_space<vmem>>, %arg4: memref<16x8xf32, #tpu.memory_space<vmem>>, %arg5: memref<224x128xf32, #tpu.memory_space<vmem>>, %arg6: memref<8x128xf32, #tpu.memory_space<vmem>>, %arg7: memref<16x32xf32, #tpu.memory_space<vmem>>) attributes {dimension_semantics = [#tpu.dimension_semantics<parallel>], iteration_bounds = array<i64: 1>, scalar_prefetch = 0 : i64, scratch_operands = 0 : i64, tpu.core_type = #tpu.core_type<tc>, window_params = [{transform_indices = @transform_0, window_bounds = array<i64: 16, 32>}, {transform_indices = @transform_1, window_bounds = array<i64: 16, 32>}, {transform_indices = @transform_2, window_bounds = array<i64: 16, 8>}, {transform_indices = @transform_3, window_bounds = array<i64: 16, 8>}, {pipeline_mode = #tpu.pipeline_mode<synchronous>, transform_indices = @transform_4, window_bounds = array<i64: 224, 128>}, {pipeline_mode = #tpu.pipeline_mode<synchronous>, transform_indices = @transform_5, window_bounds = array<i64: 8, 128>}, {transform_indices = @transform_6, window_bounds = array<i64: 16, 32>}]} {
    %c0 = arith.constant 0 : index
    %c0_0 = arith.constant 0 : index
    %0 = vector.load %arg1[%c0, %c0_0] : memref<16x32xf32, #tpu.memory_space<vmem>>, vector<16x32xf32>
    %c0_1 = arith.constant 0 : index
    %c0_2 = arith.constant 0 : index
    %1 = vector.load %arg2[%c0_1, %c0_2] : memref<16x32xf32, #tpu.memory_space<vmem>>, vector<16x32xf32>
    %c0_3 = arith.constant 0 : index
    %c0_4 = arith.constant 0 : index
    %2 = vector.load %arg5[%c0_3, %c0_4] : memref<224x128xf32, #tpu.memory_space<vmem>>, vector<32x128xf32>
    %c32 = arith.constant 32 : index
    %c0_5 = arith.constant 0 : index
    %3 = vector.load %arg5[%c32, %c0_5] : memref<224x128xf32, #tpu.memory_space<vmem>>, vector<32x128xf32>
    %cst = arith.constant dense<0.000000e+00> : vector<16x128xf32>
    %4 = tpu.matmul %0, %2, %cst {dimension_numbers = #tpu.dot_dimension_numbers<[1], [0], [0], [1], [0, 0, 1, 1], [], []>} : vector<16x32xf32>, vector<32x128xf32>, vector<16x128xf32> -> vector<16x128xf32>
    %c0_6 = arith.constant 0 : index
    %c0_7 = arith.constant 0 : index
    %5 = vector.load %arg6[%c0_6, %c0_7] : memref<8x128xf32, #tpu.memory_space<vmem>>, vector<1x128xf32>
    %6 = vector.broadcast %5 : vector<1x128xf32> to vector<16x128xf32>
    %7 = arith.addf %4, %6 : vector<16x128xf32>
    %cst_8 = arith.constant dense<0.000000e+00> : vector<16x128xf32>
    %8 = tpu.matmul %1, %3, %cst_8 {dimension_numbers = #tpu.dot_dimension_numbers<[1], [0], [0], [1], [0, 0, 1, 1], [], []>} : vector<16x32xf32>, vector<32x128xf32>, vector<16x128xf32> -> vector<16x128xf32>
    %c1 = arith.constant 1 : index
    %c0_9 = arith.constant 0 : index
    %9 = vector.load %arg6[%c1, %c0_9] : memref<8x128xf32, #tpu.memory_space<vmem>>, vector<1x128xf32>
    %10 = vector.broadcast %9 : vector<1x128xf32> to vector<16x128xf32>
    %11 = arith.addf %8, %10 : vector<16x128xf32>
    %12 = vector.extract_strided_slice %7 {offsets = [0, 0], sizes = [8, 128], strides = [1, 1]} : vector<16x128xf32> to vector<8x128xf32>
    %13 = vector.extract_strided_slice %11 {offsets = [0, 0], sizes = [8, 128], strides = [1, 1]} : vector<16x128xf32> to vector<8x128xf32>
    %c0_10 = arith.constant 0 : index
    %c0_11 = arith.constant 0 : index
    %14 = vector.load %arg3[%c0_10, %c0_11] : memref<16x8xf32, #tpu.memory_space<vmem>>, vector<8x8xf32>
    %c0_12 = arith.constant 0 : index
    %c0_13 = arith.constant 0 : index
    %15 = vector.load %arg4[%c0_12, %c0_13] : memref<16x8xf32, #tpu.memory_space<vmem>>, vector<8x8xf32>
    %cst_14 = arith.constant 0.000000e+00 : f32
    %16 = vector.broadcast %cst_14 : f32 to vector<8x128xf32>
    %17 = vector.extract_strided_slice %12 {offsets = [0, 0], sizes = [8, 8], strides = [1, 1]} : vector<8x128xf32> to vector<8x8xf32>
    %18 = vector.extract_strided_slice %12 {offsets = [0, 32], sizes = [8, 8], strides = [1, 1]} : vector<8x128xf32> to vector<8x8xf32>
    %19 = vector.extract_strided_slice %12 {offsets = [0, 64], sizes = [8, 8], strides = [1, 1]} : vector<8x128xf32> to vector<8x8xf32>
    %20 = vector.extract_strided_slice %12 {offsets = [0, 96], sizes = [8, 8], strides = [1, 1]} : vector<8x128xf32> to vector<8x8xf32>
    %21 = vector.extract_strided_slice %13 {offsets = [0, 0], sizes = [8, 8], strides = [1, 1]} : vector<8x128xf32> to vector<8x8xf32>
    %22 = vector.extract_strided_slice %13 {offsets = [0, 32], sizes = [8, 8], strides = [1, 1]} : vector<8x128xf32> to vector<8x8xf32>
    %cst_15 = arith.constant dense<0.000000e+00> : vector<8x8xf32>
    %23 = tpu.matmul %17, %21, %cst_15 {dimension_numbers = #tpu.dot_dimension_numbers<[1], [1], [0], [0], [0, 0, 1, 0], [], []>} : vector<8x8xf32>, vector<8x8xf32>, vector<8x8xf32> -> vector<8x8xf32>
    %cst_16 = arith.constant 0.353553385 : f32
    %24 = vector.broadcast %cst_16 : f32 to vector<8x8xf32>
    %25 = arith.mulf %23, %24 : vector<8x8xf32>
    %26 = arith.addf %25, %14 : vector<8x8xf32>
    %cst_17 = arith.constant dense<0.000000e+00> : vector<8x8xf32>
    %27 = tpu.matmul %18, %19, %cst_17 {dimension_numbers = #tpu.dot_dimension_numbers<[1], [1], [0], [0], [0, 0, 1, 0], [], []>} : vector<8x8xf32>, vector<8x8xf32>, vector<8x8xf32> -> vector<8x8xf32>
    %cst_18 = arith.constant 0.353553385 : f32
    %28 = vector.broadcast %cst_18 : f32 to vector<8x8xf32>
    %29 = arith.mulf %27, %28 : vector<8x8xf32>
    %30 = arith.addf %29, %15 : vector<8x8xf32>
    %cst_19 = arith.constant dense<0xFF800000> : vector<8xf32>
    %31 = vector.multi_reduction <maximumf>, %26, %cst_19 [1] : vector<8x8xf32> to vector<8xf32>
    %32 = vector.shape_cast %31 : vector<8xf32> to vector<8x1xf32>
    %33 = vector.broadcast %32 : vector<8x1xf32> to vector<8x8xf32>
    %34 = arith.subf %26, %33 : vector<8x8xf32>
    %35 = math.exp %34 : vector<8x8xf32>
    %cst_20 = arith.constant dense<0.000000e+00> : vector<8xf32>
    %36 = vector.multi_reduction <add>, %35, %cst_20 [1] : vector<8x8xf32> to vector<8xf32>
    %37 = vector.shape_cast %36 : vector<8xf32> to vector<8x1xf32>
    %38 = vector.broadcast %37 : vector<8x1xf32> to vector<8x8xf32>
    %39 = arith.divf %35, %38 : vector<8x8xf32>
    %cst_21 = arith.constant dense<0xFF800000> : vector<8xf32>
    %40 = vector.multi_reduction <maximumf>, %30, %cst_21 [1] : vector<8x8xf32> to vector<8xf32>
    %41 = vector.shape_cast %40 : vector<8xf32> to vector<8x1xf32>
    %42 = vector.broadcast %41 : vector<8x1xf32> to vector<8x8xf32>
    %43 = arith.subf %30, %42 : vector<8x8xf32>
    %44 = math.exp %43 : vector<8x8xf32>
    %cst_22 = arith.constant dense<0.000000e+00> : vector<8xf32>
    %45 = vector.multi_reduction <add>, %44, %cst_22 [1] : vector<8x8xf32> to vector<8xf32>
    %46 = vector.shape_cast %45 : vector<8xf32> to vector<8x1xf32>
    %47 = vector.broadcast %46 : vector<8x1xf32> to vector<8x8xf32>
    %48 = arith.divf %44, %47 : vector<8x8xf32>
    %cst_23 = arith.constant dense<0.000000e+00> : vector<8x8xf32>
    %49 = tpu.matmul %39, %22, %cst_23 {dimension_numbers = #tpu.dot_dimension_numbers<[1], [0], [0], [1], [0, 0, 1, 1], [], []>} : vector<8x8xf32>, vector<8x8xf32>, vector<8x8xf32> -> vector<8x8xf32>
    %cst_24 = arith.constant dense<0.000000e+00> : vector<8x8xf32>
    %50 = tpu.matmul %48, %20, %cst_24 {dimension_numbers = #tpu.dot_dimension_numbers<[1], [0], [0], [1], [0, 0, 1, 1], [], []>} : vector<8x8xf32>, vector<8x8xf32>, vector<8x8xf32> -> vector<8x8xf32>
    %c64 = arith.constant 64 : index
    %c0_25 = arith.constant 0 : index
    %51 = vector.load %arg5[%c64, %c0_25] : memref<224x128xf32, #tpu.memory_space<vmem>>, vector<8x128xf32>
    %c96 = arith.constant 96 : index
    %c0_26 = arith.constant 0 : index
    %52 = vector.load %arg5[%c96, %c0_26] : memref<224x128xf32, #tpu.memory_space<vmem>>, vector<8x128xf32>
    %cst_27 = arith.constant dense<0.000000e+00> : vector<8x128xf32>
    %53 = tpu.matmul %49, %51, %cst_27 {dimension_numbers = #tpu.dot_dimension_numbers<[1], [0], [0], [1], [0, 0, 1, 1], [], []>} : vector<8x8xf32>, vector<8x128xf32>, vector<8x128xf32> -> vector<8x128xf32>
    %54 = arith.addf %16, %53 : vector<8x128xf32>
    %cst_28 = arith.constant dense<0.000000e+00> : vector<8x128xf32>
    %55 = tpu.matmul %50, %52, %cst_28 {dimension_numbers = #tpu.dot_dimension_numbers<[1], [0], [0], [1], [0, 0, 1, 1], [], []>} : vector<8x8xf32>, vector<8x128xf32>, vector<8x128xf32> -> vector<8x128xf32>
    %56 = arith.addf %54, %55 : vector<8x128xf32>
    %57 = vector.extract_strided_slice %12 {offsets = [0, 8], sizes = [8, 8], strides = [1, 1]} : vector<8x128xf32> to vector<8x8xf32>
    %58 = vector.extract_strided_slice %12 {offsets = [0, 40], sizes = [8, 8], strides = [1, 1]} : vector<8x128xf32> to vector<8x8xf32>
    %59 = vector.extract_strided_slice %12 {offsets = [0, 72], sizes = [8, 8], strides = [1, 1]} : vector<8x128xf32> to vector<8x8xf32>
    %60 = vector.extract_strided_slice %12 {offsets = [0, 104], sizes = [8, 8], strides = [1, 1]} : vector<8x128xf32> to vector<8x8xf32>
    %61 = vector.extract_strided_slice %13 {offsets = [0, 8], sizes = [8, 8], strides = [1, 1]} : vector<8x128xf32> to vector<8x8xf32>
    %62 = vector.extract_strided_slice %13 {offsets = [0, 40], sizes = [8, 8], strides = [1, 1]} : vector<8x128xf32> to vector<8x8xf32>
    %cst_29 = arith.constant dense<0.000000e+00> : vector<8x8xf32>
    %63 = tpu.matmul %57, %61, %cst_29 {dimension_numbers = #tpu.dot_dimension_numbers<[1], [1], [0], [0], [0, 0, 1, 0], [], []>} : vector<8x8xf32>, vector<8x8xf32>, vector<8x8xf32> -> vector<8x8xf32>
    %cst_30 = arith.constant 0.353553385 : f32
    %64 = vector.broadcast %cst_30 : f32 to vector<8x8xf32>
    %65 = arith.mulf %63, %64 : vector<8x8xf32>
    %66 = arith.addf %65, %14 : vector<8x8xf32>
    %cst_31 = arith.constant dense<0.000000e+00> : vector<8x8xf32>
    %67 = tpu.matmul %58, %59, %cst_31 {dimension_numbers = #tpu.dot_dimension_numbers<[1], [1], [0], [0], [0, 0, 1, 0], [], []>} : vector<8x8xf32>, vector<8x8xf32>, vector<8x8xf32> -> vector<8x8xf32>
    %cst_32 = arith.constant 0.353553385 : f32
    %68 = vector.broadcast %cst_32 : f32 to vector<8x8xf32>
    %69 = arith.mulf %67, %68 : vector<8x8xf32>
    %70 = arith.addf %69, %15 : vector<8x8xf32>
    %cst_33 = arith.constant dense<0xFF800000> : vector<8xf32>
    %71 = vector.multi_reduction <maximumf>, %66, %cst_33 [1] : vector<8x8xf32> to vector<8xf32>
    %72 = vector.shape_cast %71 : vector<8xf32> to vector<8x1xf32>
    %73 = vector.broadcast %72 : vector<8x1xf32> to vector<8x8xf32>
    %74 = arith.subf %66, %73 : vector<8x8xf32>
    %75 = math.exp %74 : vector<8x8xf32>
    %cst_34 = arith.constant dense<0.000000e+00> : vector<8xf32>
    %76 = vector.multi_reduction <add>, %75, %cst_34 [1] : vector<8x8xf32> to vector<8xf32>
    %77 = vector.shape_cast %76 : vector<8xf32> to vector<8x1xf32>
    %78 = vector.broadcast %77 : vector<8x1xf32> to vector<8x8xf32>
    %79 = arith.divf %75, %78 : vector<8x8xf32>
    %cst_35 = arith.constant dense<0xFF800000> : vector<8xf32>
    %80 = vector.multi_reduction <maximumf>, %70, %cst_35 [1] : vector<8x8xf32> to vector<8xf32>
    %81 = vector.shape_cast %80 : vector<8xf32> to vector<8x1xf32>
    %82 = vector.broadcast %81 : vector<8x1xf32> to vector<8x8xf32>
    %83 = arith.subf %70, %82 : vector<8x8xf32>
    %84 = math.exp %83 : vector<8x8xf32>
    %cst_36 = arith.constant dense<0.000000e+00> : vector<8xf32>
    %85 = vector.multi_reduction <add>, %84, %cst_36 [1] : vector<8x8xf32> to vector<8xf32>
    %86 = vector.shape_cast %85 : vector<8xf32> to vector<8x1xf32>
    %87 = vector.broadcast %86 : vector<8x1xf32> to vector<8x8xf32>
    %88 = arith.divf %84, %87 : vector<8x8xf32>
    %cst_37 = arith.constant dense<0.000000e+00> : vector<8x8xf32>
    %89 = tpu.matmul %79, %62, %cst_37 {dimension_numbers = #tpu.dot_dimension_numbers<[1], [0], [0], [1], [0, 0, 1, 1], [], []>} : vector<8x8xf32>, vector<8x8xf32>, vector<8x8xf32> -> vector<8x8xf32>
    %cst_38 = arith.constant dense<0.000000e+00> : vector<8x8xf32>
    %90 = tpu.matmul %88, %60, %cst_38 {dimension_numbers = #tpu.dot_dimension_numbers<[1], [0], [0], [1], [0, 0, 1, 1], [], []>} : vector<8x8xf32>, vector<8x8xf32>, vector<8x8xf32> -> vector<8x8xf32>
    %c72 = arith.constant 72 : index
    %c0_39 = arith.constant 0 : index
    %91 = vector.load %arg5[%c72, %c0_39] : memref<224x128xf32, #tpu.memory_space<vmem>>, vector<8x128xf32>
    %c104 = arith.constant 104 : index
    %c0_40 = arith.constant 0 : index
    %92 = vector.load %arg5[%c104, %c0_40] : memref<224x128xf32, #tpu.memory_space<vmem>>, vector<8x128xf32>
    %cst_41 = arith.constant dense<0.000000e+00> : vector<8x128xf32>
    %93 = tpu.matmul %89, %91, %cst_41 {dimension_numbers = #tpu.dot_dimension_numbers<[1], [0], [0], [1], [0, 0, 1, 1], [], []>} : vector<8x8xf32>, vector<8x128xf32>, vector<8x128xf32> -> vector<8x128xf32>
    %94 = arith.addf %56, %93 : vector<8x128xf32>
    %cst_42 = arith.constant dense<0.000000e+00> : vector<8x128xf32>
    %95 = tpu.matmul %90, %92, %cst_42 {dimension_numbers = #tpu.dot_dimension_numbers<[1], [0], [0], [1], [0, 0, 1, 1], [], []>} : vector<8x8xf32>, vector<8x128xf32>, vector<8x128xf32> -> vector<8x128xf32>
    %96 = arith.addf %94, %95 : vector<8x128xf32>
    %97 = vector.extract_strided_slice %12 {offsets = [0, 16], sizes = [8, 8], strides = [1, 1]} : vector<8x128xf32> to vector<8x8xf32>
    %98 = vector.extract_strided_slice %12 {offsets = [0, 48], sizes = [8, 8], strides = [1, 1]} : vector<8x128xf32> to vector<8x8xf32>
    %99 = vector.extract_strided_slice %12 {offsets = [0, 80], sizes = [8, 8], strides = [1, 1]} : vector<8x128xf32> to vector<8x8xf32>
    %100 = vector.extract_strided_slice %12 {offsets = [0, 112], sizes = [8, 8], strides = [1, 1]} : vector<8x128xf32> to vector<8x8xf32>
    %101 = vector.extract_strided_slice %13 {offsets = [0, 16], sizes = [8, 8], strides = [1, 1]} : vector<8x128xf32> to vector<8x8xf32>
    %102 = vector.extract_strided_slice %13 {offsets = [0, 48], sizes = [8, 8], strides = [1, 1]} : vector<8x128xf32> to vector<8x8xf32>
    %cst_43 = arith.constant dense<0.000000e+00> : vector<8x8xf32>
    %103 = tpu.matmul %97, %101, %cst_43 {dimension_numbers = #tpu.dot_dimension_numbers<[1], [1], [0], [0], [0, 0, 1, 0], [], []>} : vector<8x8xf32>, vector<8x8xf32>, vector<8x8xf32> -> vector<8x8xf32>
    %cst_44 = arith.constant 0.353553385 : f32
    %104 = vector.broadcast %cst_44 : f32 to vector<8x8xf32>
    %105 = arith.mulf %103, %104 : vector<8x8xf32>
    %106 = arith.addf %105, %14 : vector<8x8xf32>
    %cst_45 = arith.constant dense<0.000000e+00> : vector<8x8xf32>
    %107 = tpu.matmul %98, %99, %cst_45 {dimension_numbers = #tpu.dot_dimension_numbers<[1], [1], [0], [0], [0, 0, 1, 0], [], []>} : vector<8x8xf32>, vector<8x8xf32>, vector<8x8xf32> -> vector<8x8xf32>
    %cst_46 = arith.constant 0.353553385 : f32
    %108 = vector.broadcast %cst_46 : f32 to vector<8x8xf32>
    %109 = arith.mulf %107, %108 : vector<8x8xf32>
    %110 = arith.addf %109, %15 : vector<8x8xf32>
    %cst_47 = arith.constant dense<0xFF800000> : vector<8xf32>
    %111 = vector.multi_reduction <maximumf>, %106, %cst_47 [1] : vector<8x8xf32> to vector<8xf32>
    %112 = vector.shape_cast %111 : vector<8xf32> to vector<8x1xf32>
    %113 = vector.broadcast %112 : vector<8x1xf32> to vector<8x8xf32>
    %114 = arith.subf %106, %113 : vector<8x8xf32>
    %115 = math.exp %114 : vector<8x8xf32>
    %cst_48 = arith.constant dense<0.000000e+00> : vector<8xf32>
    %116 = vector.multi_reduction <add>, %115, %cst_48 [1] : vector<8x8xf32> to vector<8xf32>
    %117 = vector.shape_cast %116 : vector<8xf32> to vector<8x1xf32>
    %118 = vector.broadcast %117 : vector<8x1xf32> to vector<8x8xf32>
    %119 = arith.divf %115, %118 : vector<8x8xf32>
    %cst_49 = arith.constant dense<0xFF800000> : vector<8xf32>
    %120 = vector.multi_reduction <maximumf>, %110, %cst_49 [1] : vector<8x8xf32> to vector<8xf32>
    %121 = vector.shape_cast %120 : vector<8xf32> to vector<8x1xf32>
    %122 = vector.broadcast %121 : vector<8x1xf32> to vector<8x8xf32>
    %123 = arith.subf %110, %122 : vector<8x8xf32>
    %124 = math.exp %123 : vector<8x8xf32>
    %cst_50 = arith.constant dense<0.000000e+00> : vector<8xf32>
    %125 = vector.multi_reduction <add>, %124, %cst_50 [1] : vector<8x8xf32> to vector<8xf32>
    %126 = vector.shape_cast %125 : vector<8xf32> to vector<8x1xf32>
    %127 = vector.broadcast %126 : vector<8x1xf32> to vector<8x8xf32>
    %128 = arith.divf %124, %127 : vector<8x8xf32>
    %cst_51 = arith.constant dense<0.000000e+00> : vector<8x8xf32>
    %129 = tpu.matmul %119, %102, %cst_51 {dimension_numbers = #tpu.dot_dimension_numbers<[1], [0], [0], [1], [0, 0, 1, 1], [], []>} : vector<8x8xf32>, vector<8x8xf32>, vector<8x8xf32> -> vector<8x8xf32>
    %cst_52 = arith.constant dense<0.000000e+00> : vector<8x8xf32>
    %130 = tpu.matmul %128, %100, %cst_52 {dimension_numbers = #tpu.dot_dimension_numbers<[1], [0], [0], [1], [0, 0, 1, 1], [], []>} : vector<8x8xf32>, vector<8x8xf32>, vector<8x8xf32> -> vector<8x8xf32>
    %c80 = arith.constant 80 : index
    %c0_53 = arith.constant 0 : index
    %131 = vector.load %arg5[%c80, %c0_53] : memref<224x128xf32, #tpu.memory_space<vmem>>, vector<8x128xf32>
    %c112 = arith.constant 112 : index
    %c0_54 = arith.constant 0 : index
    %132 = vector.load %arg5[%c112, %c0_54] : memref<224x128xf32, #tpu.memory_space<vmem>>, vector<8x128xf32>
    %cst_55 = arith.constant dense<0.000000e+00> : vector<8x128xf32>
    %133 = tpu.matmul %129, %131, %cst_55 {dimension_numbers = #tpu.dot_dimension_numbers<[1], [0], [0], [1], [0, 0, 1, 1], [], []>} : vector<8x8xf32>, vector<8x128xf32>, vector<8x128xf32> -> vector<8x128xf32>
    %134 = arith.addf %96, %133 : vector<8x128xf32>
    %cst_56 = arith.constant dense<0.000000e+00> : vector<8x128xf32>
    %135 = tpu.matmul %130, %132, %cst_56 {dimension_numbers = #tpu.dot_dimension_numbers<[1], [0], [0], [1], [0, 0, 1, 1], [], []>} : vector<8x8xf32>, vector<8x128xf32>, vector<8x128xf32> -> vector<8x128xf32>
    %136 = arith.addf %134, %135 : vector<8x128xf32>
    %137 = vector.extract_strided_slice %12 {offsets = [0, 24], sizes = [8, 8], strides = [1, 1]} : vector<8x128xf32> to vector<8x8xf32>
    %138 = vector.extract_strided_slice %12 {offsets = [0, 56], sizes = [8, 8], strides = [1, 1]} : vector<8x128xf32> to vector<8x8xf32>
    %139 = vector.extract_strided_slice %12 {offsets = [0, 88], sizes = [8, 8], strides = [1, 1]} : vector<8x128xf32> to vector<8x8xf32>
    %140 = vector.extract_strided_slice %12 {offsets = [0, 120], sizes = [8, 8], strides = [1, 1]} : vector<8x128xf32> to vector<8x8xf32>
    %141 = vector.extract_strided_slice %13 {offsets = [0, 24], sizes = [8, 8], strides = [1, 1]} : vector<8x128xf32> to vector<8x8xf32>
    %142 = vector.extract_strided_slice %13 {offsets = [0, 56], sizes = [8, 8], strides = [1, 1]} : vector<8x128xf32> to vector<8x8xf32>
    %cst_57 = arith.constant dense<0.000000e+00> : vector<8x8xf32>
    %143 = tpu.matmul %137, %141, %cst_57 {dimension_numbers = #tpu.dot_dimension_numbers<[1], [1], [0], [0], [0, 0, 1, 0], [], []>} : vector<8x8xf32>, vector<8x8xf32>, vector<8x8xf32> -> vector<8x8xf32>
    %cst_58 = arith.constant 0.353553385 : f32
    %144 = vector.broadcast %cst_58 : f32 to vector<8x8xf32>
    %145 = arith.mulf %143, %144 : vector<8x8xf32>
    %146 = arith.addf %145, %14 : vector<8x8xf32>
    %cst_59 = arith.constant dense<0.000000e+00> : vector<8x8xf32>
    %147 = tpu.matmul %138, %139, %cst_59 {dimension_numbers = #tpu.dot_dimension_numbers<[1], [1], [0], [0], [0, 0, 1, 0], [], []>} : vector<8x8xf32>, vector<8x8xf32>, vector<8x8xf32> -> vector<8x8xf32>
    %cst_60 = arith.constant 0.353553385 : f32
    %148 = vector.broadcast %cst_60 : f32 to vector<8x8xf32>
    %149 = arith.mulf %147, %148 : vector<8x8xf32>
    %150 = arith.addf %149, %15 : vector<8x8xf32>
    %cst_61 = arith.constant dense<0xFF800000> : vector<8xf32>
    %151 = vector.multi_reduction <maximumf>, %146, %cst_61 [1] : vector<8x8xf32> to vector<8xf32>
    %152 = vector.shape_cast %151 : vector<8xf32> to vector<8x1xf32>
    %153 = vector.broadcast %152 : vector<8x1xf32> to vector<8x8xf32>
    %154 = arith.subf %146, %153 : vector<8x8xf32>
    %155 = math.exp %154 : vector<8x8xf32>
    %cst_62 = arith.constant dense<0.000000e+00> : vector<8xf32>
    %156 = vector.multi_reduction <add>, %155, %cst_62 [1] : vector<8x8xf32> to vector<8xf32>
    %157 = vector.shape_cast %156 : vector<8xf32> to vector<8x1xf32>
    %158 = vector.broadcast %157 : vector<8x1xf32> to vector<8x8xf32>
    %159 = arith.divf %155, %158 : vector<8x8xf32>
    %cst_63 = arith.constant dense<0xFF800000> : vector<8xf32>
    %160 = vector.multi_reduction <maximumf>, %150, %cst_63 [1] : vector<8x8xf32> to vector<8xf32>
    %161 = vector.shape_cast %160 : vector<8xf32> to vector<8x1xf32>
    %162 = vector.broadcast %161 : vector<8x1xf32> to vector<8x8xf32>
    %163 = arith.subf %150, %162 : vector<8x8xf32>
    %164 = math.exp %163 : vector<8x8xf32>
    %cst_64 = arith.constant dense<0.000000e+00> : vector<8xf32>
    %165 = vector.multi_reduction <add>, %164, %cst_64 [1] : vector<8x8xf32> to vector<8xf32>
    %166 = vector.shape_cast %165 : vector<8xf32> to vector<8x1xf32>
    %167 = vector.broadcast %166 : vector<8x1xf32> to vector<8x8xf32>
    %168 = arith.divf %164, %167 : vector<8x8xf32>
    %cst_65 = arith.constant dense<0.000000e+00> : vector<8x8xf32>
    %169 = tpu.matmul %159, %142, %cst_65 {dimension_numbers = #tpu.dot_dimension_numbers<[1], [0], [0], [1], [0, 0, 1, 1], [], []>} : vector<8x8xf32>, vector<8x8xf32>, vector<8x8xf32> -> vector<8x8xf32>
    %cst_66 = arith.constant dense<0.000000e+00> : vector<8x8xf32>
    %170 = tpu.matmul %168, %140, %cst_66 {dimension_numbers = #tpu.dot_dimension_numbers<[1], [0], [0], [1], [0, 0, 1, 1], [], []>} : vector<8x8xf32>, vector<8x8xf32>, vector<8x8xf32> -> vector<8x8xf32>
    %c88 = arith.constant 88 : index
    %c0_67 = arith.constant 0 : index
    %171 = vector.load %arg5[%c88, %c0_67] : memref<224x128xf32, #tpu.memory_space<vmem>>, vector<8x128xf32>
    %c120 = arith.constant 120 : index
    %c0_68 = arith.constant 0 : index
    %172 = vector.load %arg5[%c120, %c0_68] : memref<224x128xf32, #tpu.memory_space<vmem>>, vector<8x128xf32>
    %cst_69 = arith.constant dense<0.000000e+00> : vector<8x128xf32>
    %173 = tpu.matmul %169, %171, %cst_69 {dimension_numbers = #tpu.dot_dimension_numbers<[1], [0], [0], [1], [0, 0, 1, 1], [], []>} : vector<8x8xf32>, vector<8x128xf32>, vector<8x128xf32> -> vector<8x128xf32>
    %174 = arith.addf %136, %173 : vector<8x128xf32>
    %cst_70 = arith.constant dense<0.000000e+00> : vector<8x128xf32>
    %175 = tpu.matmul %170, %172, %cst_70 {dimension_numbers = #tpu.dot_dimension_numbers<[1], [0], [0], [1], [0, 0, 1, 1], [], []>} : vector<8x8xf32>, vector<8x128xf32>, vector<8x128xf32> -> vector<8x128xf32>
    %176 = arith.addf %174, %175 : vector<8x128xf32>
    %177 = vector.extract_strided_slice %7 {offsets = [8, 0], sizes = [8, 128], strides = [1, 1]} : vector<16x128xf32> to vector<8x128xf32>
    %178 = vector.extract_strided_slice %11 {offsets = [8, 0], sizes = [8, 128], strides = [1, 1]} : vector<16x128xf32> to vector<8x128xf32>
    %c8 = arith.constant 8 : index
    %c0_71 = arith.constant 0 : index
    %179 = vector.load %arg3[%c8, %c0_71] : memref<16x8xf32, #tpu.memory_space<vmem>>, vector<8x8xf32>
    %c8_72 = arith.constant 8 : index
    %c0_73 = arith.constant 0 : index
    %180 = vector.load %arg4[%c8_72, %c0_73] : memref<16x8xf32, #tpu.memory_space<vmem>>, vector<8x8xf32>
    %cst_74 = arith.constant 0.000000e+00 : f32
    %181 = vector.broadcast %cst_74 : f32 to vector<8x128xf32>
    %182 = vector.extract_strided_slice %177 {offsets = [0, 0], sizes = [8, 8], strides = [1, 1]} : vector<8x128xf32> to vector<8x8xf32>
    %183 = vector.extract_strided_slice %177 {offsets = [0, 32], sizes = [8, 8], strides = [1, 1]} : vector<8x128xf32> to vector<8x8xf32>
    %184 = vector.extract_strided_slice %177 {offsets = [0, 64], sizes = [8, 8], strides = [1, 1]} : vector<8x128xf32> to vector<8x8xf32>
    %185 = vector.extract_strided_slice %177 {offsets = [0, 96], sizes = [8, 8], strides = [1, 1]} : vector<8x128xf32> to vector<8x8xf32>
    %186 = vector.extract_strided_slice %178 {offsets = [0, 0], sizes = [8, 8], strides = [1, 1]} : vector<8x128xf32> to vector<8x8xf32>
    %187 = vector.extract_strided_slice %178 {offsets = [0, 32], sizes = [8, 8], strides = [1, 1]} : vector<8x128xf32> to vector<8x8xf32>
    %cst_75 = arith.constant dense<0.000000e+00> : vector<8x8xf32>
    %188 = tpu.matmul %182, %186, %cst_75 {dimension_numbers = #tpu.dot_dimension_numbers<[1], [1], [0], [0], [0, 0, 1, 0], [], []>} : vector<8x8xf32>, vector<8x8xf32>, vector<8x8xf32> -> vector<8x8xf32>
    %cst_76 = arith.constant 0.353553385 : f32
    %189 = vector.broadcast %cst_76 : f32 to vector<8x8xf32>
    %190 = arith.mulf %188, %189 : vector<8x8xf32>
    %191 = arith.addf %190, %179 : vector<8x8xf32>
    %cst_77 = arith.constant dense<0.000000e+00> : vector<8x8xf32>
    %192 = tpu.matmul %183, %184, %cst_77 {dimension_numbers = #tpu.dot_dimension_numbers<[1], [1], [0], [0], [0, 0, 1, 0], [], []>} : vector<8x8xf32>, vector<8x8xf32>, vector<8x8xf32> -> vector<8x8xf32>
    %cst_78 = arith.constant 0.353553385 : f32
    %193 = vector.broadcast %cst_78 : f32 to vector<8x8xf32>
    %194 = arith.mulf %192, %193 : vector<8x8xf32>
    %195 = arith.addf %194, %180 : vector<8x8xf32>
    %cst_79 = arith.constant dense<0xFF800000> : vector<8xf32>
    %196 = vector.multi_reduction <maximumf>, %191, %cst_79 [1] : vector<8x8xf32> to vector<8xf32>
    %197 = vector.shape_cast %196 : vector<8xf32> to vector<8x1xf32>
    %198 = vector.broadcast %197 : vector<8x1xf32> to vector<8x8xf32>
    %199 = arith.subf %191, %198 : vector<8x8xf32>
    %200 = math.exp %199 : vector<8x8xf32>
    %cst_80 = arith.constant dense<0.000000e+00> : vector<8xf32>
    %201 = vector.multi_reduction <add>, %200, %cst_80 [1] : vector<8x8xf32> to vector<8xf32>
    %202 = vector.shape_cast %201 : vector<8xf32> to vector<8x1xf32>
    %203 = vector.broadcast %202 : vector<8x1xf32> to vector<8x8xf32>
    %204 = arith.divf %200, %203 : vector<8x8xf32>
    %cst_81 = arith.constant dense<0xFF800000> : vector<8xf32>
    %205 = vector.multi_reduction <maximumf>, %195, %cst_81 [1] : vector<8x8xf32> to vector<8xf32>
    %206 = vector.shape_cast %205 : vector<8xf32> to vector<8x1xf32>
    %207 = vector.broadcast %206 : vector<8x1xf32> to vector<8x8xf32>
    %208 = arith.subf %195, %207 : vector<8x8xf32>
    %209 = math.exp %208 : vector<8x8xf32>
    %cst_82 = arith.constant dense<0.000000e+00> : vector<8xf32>
    %210 = vector.multi_reduction <add>, %209, %cst_82 [1] : vector<8x8xf32> to vector<8xf32>
    %211 = vector.shape_cast %210 : vector<8xf32> to vector<8x1xf32>
    %212 = vector.broadcast %211 : vector<8x1xf32> to vector<8x8xf32>
    %213 = arith.divf %209, %212 : vector<8x8xf32>
    %cst_83 = arith.constant dense<0.000000e+00> : vector<8x8xf32>
    %214 = tpu.matmul %204, %187, %cst_83 {dimension_numbers = #tpu.dot_dimension_numbers<[1], [0], [0], [1], [0, 0, 1, 1], [], []>} : vector<8x8xf32>, vector<8x8xf32>, vector<8x8xf32> -> vector<8x8xf32>
    %cst_84 = arith.constant dense<0.000000e+00> : vector<8x8xf32>
    %215 = tpu.matmul %213, %185, %cst_84 {dimension_numbers = #tpu.dot_dimension_numbers<[1], [0], [0], [1], [0, 0, 1, 1], [], []>} : vector<8x8xf32>, vector<8x8xf32>, vector<8x8xf32> -> vector<8x8xf32>
    %c64_85 = arith.constant 64 : index
    %c0_86 = arith.constant 0 : index
    %216 = vector.load %arg5[%c64_85, %c0_86] : memref<224x128xf32, #tpu.memory_space<vmem>>, vector<8x128xf32>
    %c96_87 = arith.constant 96 : index
    %c0_88 = arith.constant 0 : index
    %217 = vector.load %arg5[%c96_87, %c0_88] : memref<224x128xf32, #tpu.memory_space<vmem>>, vector<8x128xf32>
    %cst_89 = arith.constant dense<0.000000e+00> : vector<8x128xf32>
    %218 = tpu.matmul %214, %216, %cst_89 {dimension_numbers = #tpu.dot_dimension_numbers<[1], [0], [0], [1], [0, 0, 1, 1], [], []>} : vector<8x8xf32>, vector<8x128xf32>, vector<8x128xf32> -> vector<8x128xf32>
    %219 = arith.addf %181, %218 : vector<8x128xf32>
    %cst_90 = arith.constant dense<0.000000e+00> : vector<8x128xf32>
    %220 = tpu.matmul %215, %217, %cst_90 {dimension_numbers = #tpu.dot_dimension_numbers<[1], [0], [0], [1], [0, 0, 1, 1], [], []>} : vector<8x8xf32>, vector<8x128xf32>, vector<8x128xf32> -> vector<8x128xf32>
    %221 = arith.addf %219, %220 : vector<8x128xf32>
    %222 = vector.extract_strided_slice %177 {offsets = [0, 8], sizes = [8, 8], strides = [1, 1]} : vector<8x128xf32> to vector<8x8xf32>
    %223 = vector.extract_strided_slice %177 {offsets = [0, 40], sizes = [8, 8], strides = [1, 1]} : vector<8x128xf32> to vector<8x8xf32>
    %224 = vector.extract_strided_slice %177 {offsets = [0, 72], sizes = [8, 8], strides = [1, 1]} : vector<8x128xf32> to vector<8x8xf32>
    %225 = vector.extract_strided_slice %177 {offsets = [0, 104], sizes = [8, 8], strides = [1, 1]} : vector<8x128xf32> to vector<8x8xf32>
    %226 = vector.extract_strided_slice %178 {offsets = [0, 8], sizes = [8, 8], strides = [1, 1]} : vector<8x128xf32> to vector<8x8xf32>
    %227 = vector.extract_strided_slice %178 {offsets = [0, 40], sizes = [8, 8], strides = [1, 1]} : vector<8x128xf32> to vector<8x8xf32>
    %cst_91 = arith.constant dense<0.000000e+00> : vector<8x8xf32>
    %228 = tpu.matmul %222, %226, %cst_91 {dimension_numbers = #tpu.dot_dimension_numbers<[1], [1], [0], [0], [0, 0, 1, 0], [], []>} : vector<8x8xf32>, vector<8x8xf32>, vector<8x8xf32> -> vector<8x8xf32>
    %cst_92 = arith.constant 0.353553385 : f32
    %229 = vector.broadcast %cst_92 : f32 to vector<8x8xf32>
    %230 = arith.mulf %228, %229 : vector<8x8xf32>
    %231 = arith.addf %230, %179 : vector<8x8xf32>
    %cst_93 = arith.constant dense<0.000000e+00> : vector<8x8xf32>
    %232 = tpu.matmul %223, %224, %cst_93 {dimension_numbers = #tpu.dot_dimension_numbers<[1], [1], [0], [0], [0, 0, 1, 0], [], []>} : vector<8x8xf32>, vector<8x8xf32>, vector<8x8xf32> -> vector<8x8xf32>
    %cst_94 = arith.constant 0.353553385 : f32
    %233 = vector.broadcast %cst_94 : f32 to vector<8x8xf32>
    %234 = arith.mulf %232, %233 : vector<8x8xf32>
    %235 = arith.addf %234, %180 : vector<8x8xf32>
    %cst_95 = arith.constant dense<0xFF800000> : vector<8xf32>
    %236 = vector.multi_reduction <maximumf>, %231, %cst_95 [1] : vector<8x8xf32> to vector<8xf32>
    %237 = vector.shape_cast %236 : vector<8xf32> to vector<8x1xf32>
    %238 = vector.broadcast %237 : vector<8x1xf32> to vector<8x8xf32>
    %239 = arith.subf %231, %238 : vector<8x8xf32>
    %240 = math.exp %239 : vector<8x8xf32>
    %cst_96 = arith.constant dense<0.000000e+00> : vector<8xf32>
    %241 = vector.multi_reduction <add>, %240, %cst_96 [1] : vector<8x8xf32> to vector<8xf32>
    %242 = vector.shape_cast %241 : vector<8xf32> to vector<8x1xf32>
    %243 = vector.broadcast %242 : vector<8x1xf32> to vector<8x8xf32>
    %244 = arith.divf %240, %243 : vector<8x8xf32>
    %cst_97 = arith.constant dense<0xFF800000> : vector<8xf32>
    %245 = vector.multi_reduction <maximumf>, %235, %cst_97 [1] : vector<8x8xf32> to vector<8xf32>
    %246 = vector.shape_cast %245 : vector<8xf32> to vector<8x1xf32>
    %247 = vector.broadcast %246 : vector<8x1xf32> to vector<8x8xf32>
    %248 = arith.subf %235, %247 : vector<8x8xf32>
    %249 = math.exp %248 : vector<8x8xf32>
    %cst_98 = arith.constant dense<0.000000e+00> : vector<8xf32>
    %250 = vector.multi_reduction <add>, %249, %cst_98 [1] : vector<8x8xf32> to vector<8xf32>
    %251 = vector.shape_cast %250 : vector<8xf32> to vector<8x1xf32>
    %252 = vector.broadcast %251 : vector<8x1xf32> to vector<8x8xf32>
    %253 = arith.divf %249, %252 : vector<8x8xf32>
    %cst_99 = arith.constant dense<0.000000e+00> : vector<8x8xf32>
    %254 = tpu.matmul %244, %227, %cst_99 {dimension_numbers = #tpu.dot_dimension_numbers<[1], [0], [0], [1], [0, 0, 1, 1], [], []>} : vector<8x8xf32>, vector<8x8xf32>, vector<8x8xf32> -> vector<8x8xf32>
    %cst_100 = arith.constant dense<0.000000e+00> : vector<8x8xf32>
    %255 = tpu.matmul %253, %225, %cst_100 {dimension_numbers = #tpu.dot_dimension_numbers<[1], [0], [0], [1], [0, 0, 1, 1], [], []>} : vector<8x8xf32>, vector<8x8xf32>, vector<8x8xf32> -> vector<8x8xf32>
    %c72_101 = arith.constant 72 : index
    %c0_102 = arith.constant 0 : index
    %256 = vector.load %arg5[%c72_101, %c0_102] : memref<224x128xf32, #tpu.memory_space<vmem>>, vector<8x128xf32>
    %c104_103 = arith.constant 104 : index
    %c0_104 = arith.constant 0 : index
    %257 = vector.load %arg5[%c104_103, %c0_104] : memref<224x128xf32, #tpu.memory_space<vmem>>, vector<8x128xf32>
    %cst_105 = arith.constant dense<0.000000e+00> : vector<8x128xf32>
    %258 = tpu.matmul %254, %256, %cst_105 {dimension_numbers = #tpu.dot_dimension_numbers<[1], [0], [0], [1], [0, 0, 1, 1], [], []>} : vector<8x8xf32>, vector<8x128xf32>, vector<8x128xf32> -> vector<8x128xf32>
    %259 = arith.addf %221, %258 : vector<8x128xf32>
    %cst_106 = arith.constant dense<0.000000e+00> : vector<8x128xf32>
    %260 = tpu.matmul %255, %257, %cst_106 {dimension_numbers = #tpu.dot_dimension_numbers<[1], [0], [0], [1], [0, 0, 1, 1], [], []>} : vector<8x8xf32>, vector<8x128xf32>, vector<8x128xf32> -> vector<8x128xf32>
    %261 = arith.addf %259, %260 : vector<8x128xf32>
    %262 = vector.extract_strided_slice %177 {offsets = [0, 16], sizes = [8, 8], strides = [1, 1]} : vector<8x128xf32> to vector<8x8xf32>
    %263 = vector.extract_strided_slice %177 {offsets = [0, 48], sizes = [8, 8], strides = [1, 1]} : vector<8x128xf32> to vector<8x8xf32>
    %264 = vector.extract_strided_slice %177 {offsets = [0, 80], sizes = [8, 8], strides = [1, 1]} : vector<8x128xf32> to vector<8x8xf32>
    %265 = vector.extract_strided_slice %177 {offsets = [0, 112], sizes = [8, 8], strides = [1, 1]} : vector<8x128xf32> to vector<8x8xf32>
    %266 = vector.extract_strided_slice %178 {offsets = [0, 16], sizes = [8, 8], strides = [1, 1]} : vector<8x128xf32> to vector<8x8xf32>
    %267 = vector.extract_strided_slice %178 {offsets = [0, 48], sizes = [8, 8], strides = [1, 1]} : vector<8x128xf32> to vector<8x8xf32>
    %cst_107 = arith.constant dense<0.000000e+00> : vector<8x8xf32>
    %268 = tpu.matmul %262, %266, %cst_107 {dimension_numbers = #tpu.dot_dimension_numbers<[1], [1], [0], [0], [0, 0, 1, 0], [], []>} : vector<8x8xf32>, vector<8x8xf32>, vector<8x8xf32> -> vector<8x8xf32>
    %cst_108 = arith.constant 0.353553385 : f32
    %269 = vector.broadcast %cst_108 : f32 to vector<8x8xf32>
    %270 = arith.mulf %268, %269 : vector<8x8xf32>
    %271 = arith.addf %270, %179 : vector<8x8xf32>
    %cst_109 = arith.constant dense<0.000000e+00> : vector<8x8xf32>
    %272 = tpu.matmul %263, %264, %cst_109 {dimension_numbers = #tpu.dot_dimension_numbers<[1], [1], [0], [0], [0, 0, 1, 0], [], []>} : vector<8x8xf32>, vector<8x8xf32>, vector<8x8xf32> -> vector<8x8xf32>
    %cst_110 = arith.constant 0.353553385 : f32
    %273 = vector.broadcast %cst_110 : f32 to vector<8x8xf32>
    %274 = arith.mulf %272, %273 : vector<8x8xf32>
    %275 = arith.addf %274, %180 : vector<8x8xf32>
    %cst_111 = arith.constant dense<0xFF800000> : vector<8xf32>
    %276 = vector.multi_reduction <maximumf>, %271, %cst_111 [1] : vector<8x8xf32> to vector<8xf32>
    %277 = vector.shape_cast %276 : vector<8xf32> to vector<8x1xf32>
    %278 = vector.broadcast %277 : vector<8x1xf32> to vector<8x8xf32>
    %279 = arith.subf %271, %278 : vector<8x8xf32>
    %280 = math.exp %279 : vector<8x8xf32>
    %cst_112 = arith.constant dense<0.000000e+00> : vector<8xf32>
    %281 = vector.multi_reduction <add>, %280, %cst_112 [1] : vector<8x8xf32> to vector<8xf32>
    %282 = vector.shape_cast %281 : vector<8xf32> to vector<8x1xf32>
    %283 = vector.broadcast %282 : vector<8x1xf32> to vector<8x8xf32>
    %284 = arith.divf %280, %283 : vector<8x8xf32>
    %cst_113 = arith.constant dense<0xFF800000> : vector<8xf32>
    %285 = vector.multi_reduction <maximumf>, %275, %cst_113 [1] : vector<8x8xf32> to vector<8xf32>
    %286 = vector.shape_cast %285 : vector<8xf32> to vector<8x1xf32>
    %287 = vector.broadcast %286 : vector<8x1xf32> to vector<8x8xf32>
    %288 = arith.subf %275, %287 : vector<8x8xf32>
    %289 = math.exp %288 : vector<8x8xf32>
    %cst_114 = arith.constant dense<0.000000e+00> : vector<8xf32>
    %290 = vector.multi_reduction <add>, %289, %cst_114 [1] : vector<8x8xf32> to vector<8xf32>
    %291 = vector.shape_cast %290 : vector<8xf32> to vector<8x1xf32>
    %292 = vector.broadcast %291 : vector<8x1xf32> to vector<8x8xf32>
    %293 = arith.divf %289, %292 : vector<8x8xf32>
    %cst_115 = arith.constant dense<0.000000e+00> : vector<8x8xf32>
    %294 = tpu.matmul %284, %267, %cst_115 {dimension_numbers = #tpu.dot_dimension_numbers<[1], [0], [0], [1], [0, 0, 1, 1], [], []>} : vector<8x8xf32>, vector<8x8xf32>, vector<8x8xf32> -> vector<8x8xf32>
    %cst_116 = arith.constant dense<0.000000e+00> : vector<8x8xf32>
    %295 = tpu.matmul %293, %265, %cst_116 {dimension_numbers = #tpu.dot_dimension_numbers<[1], [0], [0], [1], [0, 0, 1, 1], [], []>} : vector<8x8xf32>, vector<8x8xf32>, vector<8x8xf32> -> vector<8x8xf32>
    %c80_117 = arith.constant 80 : index
    %c0_118 = arith.constant 0 : index
    %296 = vector.load %arg5[%c80_117, %c0_118] : memref<224x128xf32, #tpu.memory_space<vmem>>, vector<8x128xf32>
    %c112_119 = arith.constant 112 : index
    %c0_120 = arith.constant 0 : index
    %297 = vector.load %arg5[%c112_119, %c0_120] : memref<224x128xf32, #tpu.memory_space<vmem>>, vector<8x128xf32>
    %cst_121 = arith.constant dense<0.000000e+00> : vector<8x128xf32>
    %298 = tpu.matmul %294, %296, %cst_121 {dimension_numbers = #tpu.dot_dimension_numbers<[1], [0], [0], [1], [0, 0, 1, 1], [], []>} : vector<8x8xf32>, vector<8x128xf32>, vector<8x128xf32> -> vector<8x128xf32>
    %299 = arith.addf %261, %298 : vector<8x128xf32>
    %cst_122 = arith.constant dense<0.000000e+00> : vector<8x128xf32>
    %300 = tpu.matmul %295, %297, %cst_122 {dimension_numbers = #tpu.dot_dimension_numbers<[1], [0], [0], [1], [0, 0, 1, 1], [], []>} : vector<8x8xf32>, vector<8x128xf32>, vector<8x128xf32> -> vector<8x128xf32>
    %301 = arith.addf %299, %300 : vector<8x128xf32>
    %302 = vector.extract_strided_slice %177 {offsets = [0, 24], sizes = [8, 8], strides = [1, 1]} : vector<8x128xf32> to vector<8x8xf32>
    %303 = vector.extract_strided_slice %177 {offsets = [0, 56], sizes = [8, 8], strides = [1, 1]} : vector<8x128xf32> to vector<8x8xf32>
    %304 = vector.extract_strided_slice %177 {offsets = [0, 88], sizes = [8, 8], strides = [1, 1]} : vector<8x128xf32> to vector<8x8xf32>
    %305 = vector.extract_strided_slice %177 {offsets = [0, 120], sizes = [8, 8], strides = [1, 1]} : vector<8x128xf32> to vector<8x8xf32>
    %306 = vector.extract_strided_slice %178 {offsets = [0, 24], sizes = [8, 8], strides = [1, 1]} : vector<8x128xf32> to vector<8x8xf32>
    %307 = vector.extract_strided_slice %178 {offsets = [0, 56], sizes = [8, 8], strides = [1, 1]} : vector<8x128xf32> to vector<8x8xf32>
    %cst_123 = arith.constant dense<0.000000e+00> : vector<8x8xf32>
    %308 = tpu.matmul %302, %306, %cst_123 {dimension_numbers = #tpu.dot_dimension_numbers<[1], [1], [0], [0], [0, 0, 1, 0], [], []>} : vector<8x8xf32>, vector<8x8xf32>, vector<8x8xf32> -> vector<8x8xf32>
    %cst_124 = arith.constant 0.353553385 : f32
    %309 = vector.broadcast %cst_124 : f32 to vector<8x8xf32>
    %310 = arith.mulf %308, %309 : vector<8x8xf32>
    %311 = arith.addf %310, %179 : vector<8x8xf32>
    %cst_125 = arith.constant dense<0.000000e+00> : vector<8x8xf32>
    %312 = tpu.matmul %303, %304, %cst_125 {dimension_numbers = #tpu.dot_dimension_numbers<[1], [1], [0], [0], [0, 0, 1, 0], [], []>} : vector<8x8xf32>, vector<8x8xf32>, vector<8x8xf32> -> vector<8x8xf32>
    %cst_126 = arith.constant 0.353553385 : f32
    %313 = vector.broadcast %cst_126 : f32 to vector<8x8xf32>
    %314 = arith.mulf %312, %313 : vector<8x8xf32>
    %315 = arith.addf %314, %180 : vector<8x8xf32>
    %cst_127 = arith.constant dense<0xFF800000> : vector<8xf32>
    %316 = vector.multi_reduction <maximumf>, %311, %cst_127 [1] : vector<8x8xf32> to vector<8xf32>
    %317 = vector.shape_cast %316 : vector<8xf32> to vector<8x1xf32>
    %318 = vector.broadcast %317 : vector<8x1xf32> to vector<8x8xf32>
    %319 = arith.subf %311, %318 : vector<8x8xf32>
    %320 = math.exp %319 : vector<8x8xf32>
    %cst_128 = arith.constant dense<0.000000e+00> : vector<8xf32>
    %321 = vector.multi_reduction <add>, %320, %cst_128 [1] : vector<8x8xf32> to vector<8xf32>
    %322 = vector.shape_cast %321 : vector<8xf32> to vector<8x1xf32>
    %323 = vector.broadcast %322 : vector<8x1xf32> to vector<8x8xf32>
    %324 = arith.divf %320, %323 : vector<8x8xf32>
    %cst_129 = arith.constant dense<0xFF800000> : vector<8xf32>
    %325 = vector.multi_reduction <maximumf>, %315, %cst_129 [1] : vector<8x8xf32> to vector<8xf32>
    %326 = vector.shape_cast %325 : vector<8xf32> to vector<8x1xf32>
    %327 = vector.broadcast %326 : vector<8x1xf32> to vector<8x8xf32>
    %328 = arith.subf %315, %327 : vector<8x8xf32>
    %329 = math.exp %328 : vector<8x8xf32>
    %cst_130 = arith.constant dense<0.000000e+00> : vector<8xf32>
    %330 = vector.multi_reduction <add>, %329, %cst_130 [1] : vector<8x8xf32> to vector<8xf32>
    %331 = vector.shape_cast %330 : vector<8xf32> to vector<8x1xf32>
    %332 = vector.broadcast %331 : vector<8x1xf32> to vector<8x8xf32>
    %333 = arith.divf %329, %332 : vector<8x8xf32>
    %cst_131 = arith.constant dense<0.000000e+00> : vector<8x8xf32>
    %334 = tpu.matmul %324, %307, %cst_131 {dimension_numbers = #tpu.dot_dimension_numbers<[1], [0], [0], [1], [0, 0, 1, 1], [], []>} : vector<8x8xf32>, vector<8x8xf32>, vector<8x8xf32> -> vector<8x8xf32>
    %cst_132 = arith.constant dense<0.000000e+00> : vector<8x8xf32>
    %335 = tpu.matmul %333, %305, %cst_132 {dimension_numbers = #tpu.dot_dimension_numbers<[1], [0], [0], [1], [0, 0, 1, 1], [], []>} : vector<8x8xf32>, vector<8x8xf32>, vector<8x8xf32> -> vector<8x8xf32>
    %c88_133 = arith.constant 88 : index
    %c0_134 = arith.constant 0 : index
    %336 = vector.load %arg5[%c88_133, %c0_134] : memref<224x128xf32, #tpu.memory_space<vmem>>, vector<8x128xf32>
    %c120_135 = arith.constant 120 : index
    %c0_136 = arith.constant 0 : index
    %337 = vector.load %arg5[%c120_135, %c0_136] : memref<224x128xf32, #tpu.memory_space<vmem>>, vector<8x128xf32>
    %cst_137 = arith.constant dense<0.000000e+00> : vector<8x128xf32>
    %338 = tpu.matmul %334, %336, %cst_137 {dimension_numbers = #tpu.dot_dimension_numbers<[1], [0], [0], [1], [0, 0, 1, 1], [], []>} : vector<8x8xf32>, vector<8x128xf32>, vector<8x128xf32> -> vector<8x128xf32>
    %339 = arith.addf %301, %338 : vector<8x128xf32>
    %cst_138 = arith.constant dense<0.000000e+00> : vector<8x128xf32>
    %340 = tpu.matmul %335, %337, %cst_138 {dimension_numbers = #tpu.dot_dimension_numbers<[1], [0], [0], [1], [0, 0, 1, 1], [], []>} : vector<8x8xf32>, vector<8x128xf32>, vector<8x128xf32> -> vector<8x128xf32>
    %341 = arith.addf %339, %340 : vector<8x128xf32>
    %342 = tpu.concatenate %176, %341 in 0 : vector<8x128xf32>, vector<8x128xf32> -> vector<16x128xf32>
    %c2 = arith.constant 2 : index
    %c0_139 = arith.constant 0 : index
    %343 = vector.load %arg6[%c2, %c0_139] : memref<8x128xf32, #tpu.memory_space<vmem>>, vector<1x32xf32>
    %344 = vector.extract_strided_slice %342 {offsets = [0, 0], sizes = [16, 32], strides = [1, 1]} : vector<16x128xf32> to vector<16x32xf32>
    %345 = vector.broadcast %343 : vector<1x32xf32> to vector<16x32xf32>
    %346 = arith.addf %344, %345 : vector<16x32xf32>
    %cst_140 = arith.constant 0.000000e+00 : f32
    %347 = vector.broadcast %cst_140 : f32 to vector<16x32xf32>
    %348 = arith.maximumf %346, %347 : vector<16x32xf32>
    %c3 = arith.constant 3 : index
    %c0_141 = arith.constant 0 : index
    %349 = vector.load %arg6[%c3, %c0_141] : memref<8x128xf32, #tpu.memory_space<vmem>>, vector<1x32xf32>
    %c4 = arith.constant 4 : index
    %c0_142 = arith.constant 0 : index
    %350 = vector.load %arg6[%c4, %c0_142] : memref<8x128xf32, #tpu.memory_space<vmem>>, vector<1x32xf32>
    %351 = arith.addf %0, %348 : vector<16x32xf32>
    %cst_143 = arith.constant dense<0.000000e+00> : vector<16xf32>
    %352 = vector.multi_reduction <add>, %351, %cst_143 [1] : vector<16x32xf32> to vector<16xf32>
    %353 = vector.shape_cast %352 : vector<16xf32> to vector<16x1xf32>
    %cst_144 = arith.constant 3.200000e+01 : f32
    %354 = vector.broadcast %cst_144 : f32 to vector<16x1xf32>
    %355 = arith.divf %353, %354 : vector<16x1xf32>
    %356 = vector.broadcast %355 : vector<16x1xf32> to vector<16x32xf32>
    %357 = arith.subf %351, %356 : vector<16x32xf32>
    %358 = arith.mulf %357, %357 : vector<16x32xf32>
    %cst_145 = arith.constant dense<0.000000e+00> : vector<16xf32>
    %359 = vector.multi_reduction <add>, %358, %cst_145 [1] : vector<16x32xf32> to vector<16xf32>
    %360 = vector.shape_cast %359 : vector<16xf32> to vector<16x1xf32>
    %cst_146 = arith.constant 3.200000e+01 : f32
    %361 = vector.broadcast %cst_146 : f32 to vector<16x1xf32>
    %362 = arith.divf %360, %361 : vector<16x1xf32>
    %363 = vector.broadcast %355 : vector<16x1xf32> to vector<16x32xf32>
    %364 = arith.subf %351, %363 : vector<16x32xf32>
    %cst_147 = arith.constant 9.99999974E-6 : f32
    %365 = vector.broadcast %cst_147 : f32 to vector<16x1xf32>
    %366 = arith.addf %362, %365 : vector<16x1xf32>
    %367 = math.rsqrt %366 : vector<16x1xf32>
    %368 = vector.broadcast %367 : vector<16x1xf32> to vector<16x32xf32>
    %369 = arith.mulf %364, %368 : vector<16x32xf32>
    %370 = vector.broadcast %349 : vector<1x32xf32> to vector<16x32xf32>
    %371 = arith.mulf %369, %370 : vector<16x32xf32>
    %372 = vector.broadcast %350 : vector<1x32xf32> to vector<16x32xf32>
    %373 = arith.addf %371, %372 : vector<16x32xf32>
    %c128 = arith.constant 128 : index
    %c0_148 = arith.constant 0 : index
    %374 = vector.load %arg5[%c128, %c0_148] : memref<224x128xf32, #tpu.memory_space<vmem>>, vector<32x64xf32>
    %c5 = arith.constant 5 : index
    %c0_149 = arith.constant 0 : index
    %375 = vector.load %arg6[%c5, %c0_149] : memref<8x128xf32, #tpu.memory_space<vmem>>, vector<1x64xf32>
    %c160 = arith.constant 160 : index
    %c0_150 = arith.constant 0 : index
    %376 = vector.load %arg5[%c160, %c0_150] : memref<224x128xf32, #tpu.memory_space<vmem>>, vector<64x32xf32>
    %c6 = arith.constant 6 : index
    %c0_151 = arith.constant 0 : index
    %377 = vector.load %arg6[%c6, %c0_151] : memref<8x128xf32, #tpu.memory_space<vmem>>, vector<1x32xf32>
    %cst_152 = arith.constant dense<0.000000e+00> : vector<16x64xf32>
    %378 = tpu.matmul %373, %374, %cst_152 {dimension_numbers = #tpu.dot_dimension_numbers<[1], [0], [0], [1], [0, 0, 1, 1], [], []>} : vector<16x32xf32>, vector<32x64xf32>, vector<16x64xf32> -> vector<16x64xf32>
    %379 = vector.broadcast %375 : vector<1x64xf32> to vector<16x64xf32>
    %380 = arith.addf %378, %379 : vector<16x64xf32>
    %cst_153 = arith.constant 0.000000e+00 : f32
    %381 = vector.broadcast %cst_153 : f32 to vector<16x64xf32>
    %382 = arith.maximumf %380, %381 : vector<16x64xf32>
    %cst_154 = arith.constant dense<0.000000e+00> : vector<16x32xf32>
    %383 = tpu.matmul %382, %376, %cst_154 {dimension_numbers = #tpu.dot_dimension_numbers<[1], [0], [0], [1], [0, 0, 1, 1], [], []>} : vector<16x64xf32>, vector<64x32xf32>, vector<16x32xf32> -> vector<16x32xf32>
    %384 = vector.broadcast %377 : vector<1x32xf32> to vector<16x32xf32>
    %385 = arith.addf %383, %384 : vector<16x32xf32>
    %386 = arith.addf %373, %385 : vector<16x32xf32>
    %cst_155 = arith.constant dense<0.000000e+00> : vector<16xf32>
    %387 = vector.multi_reduction <add>, %386, %cst_155 [1] : vector<16x32xf32> to vector<16xf32>
    %388 = vector.shape_cast %387 : vector<16xf32> to vector<16x1xf32>
    %cst_156 = arith.constant 3.200000e+01 : f32
    %389 = vector.broadcast %cst_156 : f32 to vector<16x1xf32>
    %390 = arith.divf %388, %389 : vector<16x1xf32>
    %391 = vector.broadcast %390 : vector<16x1xf32> to vector<16x32xf32>
    %392 = arith.subf %386, %391 : vector<16x32xf32>
    %393 = arith.mulf %392, %392 : vector<16x32xf32>
    %cst_157 = arith.constant dense<0.000000e+00> : vector<16xf32>
    %394 = vector.multi_reduction <add>, %393, %cst_157 [1] : vector<16x32xf32> to vector<16xf32>
    %395 = vector.shape_cast %394 : vector<16xf32> to vector<16x1xf32>
    %cst_158 = arith.constant 3.200000e+01 : f32
    %396 = vector.broadcast %cst_158 : f32 to vector<16x1xf32>
    %397 = arith.divf %395, %396 : vector<16x1xf32>
    %398 = vector.broadcast %390 : vector<16x1xf32> to vector<16x32xf32>
    %399 = arith.subf %386, %398 : vector<16x32xf32>
    %cst_159 = arith.constant 9.99999974E-6 : f32
    %400 = vector.broadcast %cst_159 : f32 to vector<16x1xf32>
    %401 = arith.addf %397, %400 : vector<16x1xf32>
    %402 = math.rsqrt %401 : vector<16x1xf32>
    %403 = vector.broadcast %402 : vector<16x1xf32> to vector<16x32xf32>
    %404 = arith.mulf %399, %403 : vector<16x32xf32>
    %405 = vector.broadcast %349 : vector<1x32xf32> to vector<16x32xf32>
    %406 = arith.mulf %404, %405 : vector<16x32xf32>
    %407 = vector.broadcast %350 : vector<1x32xf32> to vector<16x32xf32>
    %408 = arith.addf %406, %407 : vector<16x32xf32>
    %c0_160 = arith.constant 0 : index
    %c0_161 = arith.constant 0 : index
    %409 = vector.load %arg7[%c0_160, %c0_161] : memref<16x32xf32, #tpu.memory_space<vmem>>, vector<16x32xf32>
    tpu.vector_store %arg7[%c0_160, %c0_161], %408 {strides = array<i32>} : memref<16x32xf32, #tpu.memory_space<vmem>>, vector<16x32xf32>,
    return
  }
  func.func @transform_0(%arg0: i32) -> (i32, i32) {
    %c0_i32 = arith.constant 0 : i32
    %c0_i32_0 = arith.constant 0 : i32
    return %arg0, %c0_i32 : i32, i32
  }
  func.func @transform_1(%arg0: i32) -> (i32, i32) {
    %c0_i32 = arith.constant 0 : i32
    %c0_i32_0 = arith.constant 0 : i32
    return %arg0, %c0_i32 : i32, i32
  }
  func.func @transform_2(%arg0: i32) -> (i32, i32) {
    %c0_i32 = arith.constant 0 : i32
    %c0_i32_0 = arith.constant 0 : i32
    return %arg0, %c0_i32 : i32, i32
  }
  func.func @transform_3(%arg0: i32) -> (i32, i32) {
    %c0_i32 = arith.constant 0 : i32
    %c0_i32_0 = arith.constant 0 : i32
    return %arg0, %c0_i32 : i32, i32
  }
  func.func @transform_4(%arg0: i32) -> (i32, i32) {
    %c0_i32 = arith.constant 0 : i32
    %c0_i32_0 = arith.constant 0 : i32
    %c0_i32_1 = arith.constant 0 : i32
    return %c0_i32, %c0_i32_0 : i32, i32
  }
  func.func @transform_5(%arg0: i32) -> (i32, i32) {
    %c0_i32 = arith.constant 0 : i32
    %c0_i32_0 = arith.constant 0 : i32
    %c0_i32_1 = arith.constant 0 : i32
    return %c0_i32, %c0_i32_0 : i32, i32
  }
  func.func @transform_6(%arg0: i32) -> (i32, i32) {
    %c0_i32 = arith.constant 0 : i32
    %c0_i32_0 = arith.constant 0 : i32
    return %arg0, %c0_i32 : i32, i32
  }
}

</mosaic_0001>

<bundles_post_ra>
// kernel: tpu_custom_call.1
= control target key start
LH: loop header
LB: loop body
LE: loop exit
PB: predicated region body
PF: predicated region fallthrough
CT: control target
= control target key end

     0   :  { %11 = vsyncpa [#allocation3], 0  ;;  %s5581_s0 = inlined_call_operand.vmem [shape: f32[16,32], index: 0, kind: input, shape index: {}]   ;;  %s5582_s1 = inlined_call_operand.vmem [shape: f32[16,32], index: 1, kind: input, shape index: {}]   ;;  %s5583_s2 = inlined_call_operand.vmem [shape: f32[16,8], index: 2, kind: input, shape index: {}]   ;;  %s5584_s3 = inlined_call_operand.vmem [shape: f32[16,8], index: 3, kind: input, shape index: {}]   ;;  %s5585_s4 = inlined_call_operand.hbm [shape: f32[224,128], index: 4, kind: input, shape index: {}]   ;;  %s5586_s5 = inlined_call_operand.vmem [shape: f32[8,128], index: 5, kind: input, shape index: {}]   ;;  %s5587_s6 = inlined_call_operand.hbm [shape: f32[16,32], index: 6, kind: output, shape index: {}]  }
   0x1   :  { %12 = vsyncpa [#allocation4], 0  ;;  %s5007_s21 = smov [#allocation2]  }
   0x2   :  { %s26_s22 = sshll.u32 %s5007_s21, 4  ;;  %s27_s22 = int_to_ptr.vmem [resolvable:$true] %s26_s22 }
   0x3   :  { %s4971_s23 = scalar_lea.vmem %s27_s22, 3584  ;;  %p4976_p1 = scmp.lt.s32.totalorder %s27_s22, %s27_s22 }
   0x4   :  { %p4972_p0 = scmp.ne.s32.totalorder %s27_s22, %s4971_s23  ;;  %p4977_p2 = scmp.lt.s32.totalorder %s4971_s23, %s4971_s23 }
   0x6   :  { %p4978_p3 = por %p4977_p2, %p4976_p1 }
   0x8   :  { %p4979_p4 = pnand %p4978_p3, %p4972_p0 }
   0xa   :  { %4982 = shalt.err (!%p4979_p4)
}
   0xb   :  { %s5008_s24 = smov 128   ;;  %s5009_s25 = smov 8  }
   0xc   :  { %32 = dma.hbm_to_vmem [thread:$0]  %s5585_s4, 3584, %s27_s22, [#allocation3], %s5008_s24, %s5008_s24, %s5009_s25  }
   0xd   :  { %5003 = dma.done.wait [#allocation3], 3584  }
   0xe   :  { %5004 = vsyncadd [#allocation3], 4294963712  ;;  %v45_v0 = vld [vmem:[#allocation2 + $0x18] sm:$0xff]  ;;  %v44_v2 = vld [vmem:[#allocation2 + $0x10] sm:$0xff]  ;;  %vm55_vm0 = vcmask 261120   ;;  %v5010_v12 = vmov 0.0  }
   0xf   :  { %v49_v1 = vld [vmem:[#allocation2 + $0x38] sm:$0xff]  ;;  %4577 = vmatprep.subr.mxu0 %v45_v0  ;;  %v48_v3 = vld [vmem:[#allocation2 + $0x30] sm:$0xff]  ;;  %v43_v4 = vld [vmem:[#allocation2 + $0x8] sm:$0xff]  ;;  %vm5011_vm1 = vmmov 0   ;;  %vm225_vm2 = vcmask 64512   ;;  %s5012_s14 = smov 64  }
  0x10   :  { %4588 = vmatprep.subr.mxu1 %v49_v1  ;;  %4578 = vmatpush3.msra.mxu0 %v45_v0  ;;  %v47_v5 = vld [vmem:[#allocation2 + $0x28] sm:$0xff]  ;;  %v42_v6 = vld [vmem:[#allocation2] sm:$0xff]  ;;  %s5013_s15 = smov 96   ;;  %s5014_s20 = smov 88   ;;  %vm4241_vm3 = vcmask 523264  }
  0x11   :  { %4589 = vmatpush3.msra.mxu1 %v49_v1  ;;  %4579 = vmatprep.subr.mxu0 %v44_v2  ;;  %v46_v7 = vld [vmem:[#allocation2 + $0x20] sm:$0xff]  ;;  %v39_v10 = vld [vmem:[%s5581_s0 + $0x8] sm:$0xff]  ;;  %s5015_s21 = smov 32   ;;  %s5016_s22 = smov 56  }
  0x12   :  { %4590 = vmatprep.subr.mxu1 %v48_v3  ;;  %4580 = vmatpush3.msra.mxu0 %v44_v2  ;;  %v38_v8 = vld [vmem:[%s5581_s0] sm:$0xff]  ;;  %v41_v11 = vld [vmem:[%s5582_s1 + $0x8] sm:$0xff]  ;;  %s5017_s23 = smov 120   ;;  %s5018_s26 = smov 80  }
  0x13   :  { %4591 = vmatpush3.msra.mxu1 %v48_v3  ;;  %4581 = vmatprep.subr.mxu0 %v43_v4  ;;  %v40_v9 = vld [vmem:[%s5582_s1] sm:$0xff]  ;;  %s5019_s27 = smov 24   ;;  %s5020_s4 = smov 48  }
  0x14   :  { %4592 = vmatprep.subr.mxu1 %v47_v5  ;;  %4582 = vmatpush3.msra.mxu0 %v43_v4  ;;  %v4374_v13 = vld [vmem:[%s5586_s5] ss:$0 sm:$0xff]  ;;  %v4377_v16 = vld [vmem:[%s5586_s5 + $0x1] ss:$0 sm:$0xff]  ;;  %s5021_s28 = smov 112   ;;  %s5022_s29 = smov 16  }
  0x15   :  { %4593 = vmatpush3.msra.mxu1 %v47_v5  ;;  %4583 = vmatprep.subr.mxu0 %v42_v6  ;;  %v5123_v26 = vld [vmem:[%s5583_s2] sm:$0xff]  ;;  %s5023_s30 = smov 40   ;;  %s5024_s7 = smov 104  }
  0x16   :  { %4594 = vmatprep.subr.mxu1 %v46_v7  ;;  %4584 = vmatpush3.msra.mxu0 %v42_v6  ;;  %v5130_v32 = vld [vmem:[%s5584_s3] sm:$0xff]  ;;  %s5025_s8 = smov 72  }
  0x17   :  { %4585 = vmatprep.mubr.msk.f32.mxu0 %vm55_vm0, %v38_v8  ;;  %4595 = vmatpush3.msra.mxu1 %v46_v7  ;;  %v5152_v51 = vld [vmem:[#allocation2 + $0x60] sm:$0xff] }
  0x18   :  { %4596 = vmatprep.mubr.msk.f32.mxu1 %vm55_vm0, %v40_v9  ;;  %4586 = vmatmul.mubr.msk.f32.vlgmr.msra.gmra.mxu0 %vm55_vm0, %v39_v10  ;;  %v5157_v56 = vld [vmem:[#allocation2 + $0x40] sm:$0xff] }
  0x19   :  { %4597 = vmatmul.mubr.msk.f32.vlgmr.msra.gmra.mxu1 %vm55_vm0, %v41_v11  ;;  %4599 = vmatprep.subr.mxu0 %v5010_v12 }
  0x1a   :  { %4614 = vmatprep.subr.mxu1 %v5010_v12  ;;  %4601 = vmatprep.mubr.msk.f32.mxu0 %vm5011_vm1, %v5010_v12 }
  0x1b   :  { %4616 = vmatprep.mubr.msk.f32.mxu1 %vm5011_vm1, %v5010_v12 }
  0xd8   :  { %v4587_v14 = vpop.f32.mrf.mxu0 }
  0xd9   :  { %v4598_v15 = vpop.f32.mrf.mxu1  ;;  %v5096_v17 = vadd.f32 %v4587_v14, %v4374_v13 }
  0xda   :  { %v5098_v18 = vadd.f32 %v4598_v15, %v4377_v16  ;;  %v128_v19 = vpop.f32.mrf.mxu0 }
  0xdb   :  { %v214_v20 = vpop.f32.mrf.mxu1  ;;  %v5100_v21 = vadd.f32 %v4374_v13, %v128_v19 }
  0xdc   :  { %v5102_v22 = vadd.f32 %v4377_v16, %v214_v20 }
  0xdd   :  { %306 = vrot.lane.b32.xlu0 %v5100_v21, %s5012_s14 }
  0xde   :  { %4600 = vmatpush3.xpose.msk.msra.mxu0 %vm225_vm2, %v5102_v22 }
  0xdf   :  { %4604 = vmatprep.subr.mxu0 %v5010_v12 }
  0xe1   :  { %4602 = vmatmul.mubr.msk.f32.vlgmr.msra.gmra.mxu0 %vm225_vm2, %v5100_v21  ;;  %304 = vrot.lane.b32.xlu0 %v5100_v21, %s5013_s15 }
  0xe2   :  { %4606 = vmatprep.mubr.msk.f32.mxu0 %vm5011_vm1, %v5010_v12 }
 0x14f   :  { %v307_v23 = vpop.permute.xlu0 %306 }
 0x150   :  { %4605 = vmatpush3.xpose.msk.msra.mxu0 %vm225_vm2, %v307_v23 }
 0x151   :  { %4609 = vmatprep.subr.mxu0 %v5010_v12 }
 0x153   :  { %v305_v24 = vpop.permute.xlu0 %304 }
 0x154   :  { %4607 = vmatmul.mubr.msk.f32.vlgmr.msra.gmra.mxu0 %vm225_vm2, %v305_v24 }
 0x155   :  { %4611 = vmatprep.mubr.msk.f32.mxu0 %vm5011_vm1, %v5010_v12 }
 0x1a1   :  { %v298_v25 = vpop.f32.mrf.mxu0 }
 0x1a2   :  { %v302_v27 = vmul.f32 0.35355338, %v298_v25 }
 0x1a3   :  { %v4603_v28 = vpop.f32.mrf.mxu0 }
 0x1a4   :  { %v303_v29 = vadd.f32 %v302_v27, %v5123_v26 }
 0x1a6   :  { %v384_v30 = vsel %vm225_vm2, %v303_v29, -inf }
 0x1a7   :  { %385 = vmax.xlane.f32.xlu1 %v384_v30 }
 0x214   :  { %v378_v31 = vpop.f32.mrf.mxu0 }
 0x215   :  { %v382_v33 = vmul.f32 0.35355338, %v378_v31 }
 0x216   :  { %v4608_v34 = vpop.f32.mrf.mxu0 }
 0x217   :  { %v383_v35 = vadd.f32 %v382_v33, %v5130_v32 }
 0x219   :  { %v395_v36 = vsel %vm225_vm2, %v383_v35, -inf }
 0x21a   :  { %396 = vmax.xlane.f32.xlu1 %v395_v36 }
 0x22b   :  { %406 = vrot.lane.b32.xlu1 %v5102_v22, %s5013_s15 }
 0x230   :  { %v386_v37 = vpop.xlane.xlu1 %385 }
 0x231   :  { %v387_v38 = vsub.f32 %v303_v29, %v386_v37 }
 0x233   :  { %v388_v39 = vmul.f32 1.442695, %v387_v38  ;;  %v5203_v38 = vld [vmem:[#allocation2 + $0x68] sm:$0xff] }
 0x235   :  { %4889 = vpow2.f32 %v388_v39 }
 0x242   :  { %v4890_v40 = vpop.eup %4889 }
 0x243   :  { %v390_v41 = vsel %vm225_vm2, %v4890_v40, 0.0 }
 0x244   :  { %391 = vadd.xlane.f32.xlu0 %v390_v41  ;;  %v5214_v41 = vld [vmem:[#allocation2 + $0x48] sm:$0xff] }
 0x25a   :  { %786 = vrot.lane.b32.xlu0 %v5100_v21, %s5014_s20 }
 0x2a3   :  { %v397_v42 = vpop.xlane.xlu1 %396 }
 0x2a4   :  { %v398_v43 = vsub.f32 %v383_v35, %v397_v42 }
 0x2a6   :  { %v399_v44 = vmul.f32 1.442695, %v398_v43 }
 0x2a7   :  { %v407_v45 = vpop.permute.xlu1 %406 }
 0x2a8   :  { %4891 = vpow2.f32 %v399_v44  ;;  %4610 = vmatpush3.msra.mxu0 %v407_v45 }
 0x2a9   :  { %4619 = vmatprep.subr.mxu0 %v5010_v12 }
 0x2b5   :  { %v4892_v46 = vpop.eup %4891 }
 0x2b6   :  { %v401_v47 = vsel %vm225_vm2, %v4892_v46, 0.0 }
 0x2b7   :  { %402 = vadd.xlane.f32.xlu1 %v401_v47 }
 0x2c8   :  { %482 = vrot.lane.b32.xlu1 %v5100_v21, %s5015_s21 }
 0x2cc   :  { %788 = vrot.lane.b32.xlu1 %v5100_v21, %s5016_s22 }
 0x2cd   :  { %v392_v48 = vpop.xlane.xlu0 %391 }
 0x2ce   :  { %4893 = vrcp.f32 %v392_v48 }
 0x2d0   :  { %708 = vrot.lane.b32.xlu1 %v5102_v22, %s5017_s23 }
 0x2d1   :  { %v787_v60 = vpop.permute.xlu0 %786 }
 0x2d4   :  { %706 = vrot.lane.b32.xlu1 %v5100_v21, %s5017_s23 }
 0x2db   :  { %v4894_v49 = vpop.eup %4893 }
 0x2dc   :  { %v394_v50 = vmul.f32 %v4894_v49, %v4890_v40 }
 0x2de   :  { %4612 = vmatmul.mubr.msk.f32.vlgmr.msra.gmra.mxu0 %vm225_vm2, %v394_v50 }
 0x2df   :  { %4621 = vmatprep.mubr.msk.f32.mxu0 %vm5011_vm1, %v5010_v12  ;;  %4620 = vmatpush3.msra.mxu0 %v5152_v51 }
 0x2e0   :  { %4629 = vmatprep.subr.mxu0 %v5010_v12 }
 0x340   :  { %v403_v52 = vpop.xlane.xlu1 %402 }
 0x341   :  { %4895 = vrcp.f32 %v403_v52 }
 0x344   :  { %v483_v53 = vpop.permute.xlu1 %482 }
 0x345   :  { %4615 = vmatpush3.msra.mxu1 %v483_v53 }
 0x346   :  { %4624 = vmatprep.subr.mxu1 %v5010_v12 }
 0x348   :  { %v789_v58 = vpop.permute.xlu1 %788 }
 0x34c   :  { %v709_v61 = vpop.permute.xlu1 %708 }
 0x34e   :  { %v4896_v54 = vpop.eup %4895 }
 0x34f   :  { %v405_v55 = vmul.f32 %v4896_v54, %v4892_v46 }
 0x350   :  { %v707_v0 = vpop.permute.xlu1 %706 }
 0x351   :  { %4617 = vmatmul.mubr.msk.f32.vlgmr.msra.gmra.mxu1 %vm225_vm2, %v405_v55 }
 0x352   :  { %4625 = vmatpush3.msra.mxu1 %v5157_v56  ;;  %4626 = vmatprep.mubr.msk.f32.mxu1 %vm5011_vm1, %v5010_v12 }
 0x353   :  { %4634 = vmatprep.subr.mxu1 %v5010_v12 }
 0x39e   :  { %v478_v57 = vpop.f32.mrf.mxu0 }
 0x39f   :  { %4627 = vmatmul.mubr.msk.f32.vlgmr.msra.gmra.mxu1 %vm225_vm2, %v478_v57 }
 0x3a0   :  { %4635 = vmatpush3.xpose.msk.msra.mxu1 %vm225_vm2, %v789_v58  ;;  %v4613_v59 = vpop.f32.mrf.mxu0  ;;  %4636 = vmatprep.mubr.msk.f32.mxu1 %vm5011_vm1, %v5010_v12 }
 0x3a1   :  { %4644 = vmatprep.subr.mxu1 %v5010_v12 }
 0x3a3   :  { %4637 = vmatmul.mubr.msk.f32.vlgmr.msra.gmra.mxu1 %vm225_vm2, %v787_v60 }
 0x3a4   :  { %4646 = vmatprep.mubr.msk.f32.mxu1 %vm5011_vm1, %v5010_v12 }
 0x411   :  { %v554_v62 = vpop.f32.mrf.mxu1 }
 0x412   :  { %4622 = vmatmul.mubr.msk.f32.vlgmr.msra.gmra.mxu0 %vm225_vm2, %v554_v62 }
 0x413   :  { %4630 = vmatpush3.xpose.msk.msra.mxu0 %vm225_vm2, %v709_v61  ;;  %v4618_v63 = vpop.f32.mrf.mxu1  ;;  %4631 = vmatprep.mubr.msk.f32.mxu0 %vm5011_vm1, %v5010_v12 }
 0x414   :  { %4639 = vmatprep.subr.mxu0 %v5010_v12 }
 0x416   :  { %4632 = vmatmul.mubr.msk.f32.vlgmr.msra.gmra.mxu0 %vm225_vm2, %v707_v0 }
 0x417   :  { %4641 = vmatprep.mubr.msk.f32.mxu0 %vm5011_vm1, %v5010_v12 }
 0x45f   :  { %v5180_v1 = vpop.f32.mrf.mxu1 }
 0x461   :  { %v4628_v2 = vpop.f32.mrf.mxu1 }
 0x463   :  { %v860_v3 = vpop.f32.mrf.mxu1 }
 0x464   :  { %v864_v4 = vmul.f32 0.35355338, %v860_v3 }
 0x465   :  { %v4638_v5 = vpop.f32.mrf.mxu1 }
 0x466   :  { %v865_v6 = vadd.f32 %v864_v4, %v5130_v32 }
 0x468   :  { %v877_v7 = vsel %vm225_vm2, %v865_v6, -inf }
 0x469   :  { %878 = vmax.xlane.f32.xlu1 %v877_v7 }
 0x4d2   :  { %v5184_v8 = vpop.f32.mrf.mxu0 }
 0x4d3   :  { %v703_v59 = vadd.f32 %v5180_v1, %v5184_v8 }
 0x4d4   :  { %v4623_v9 = vpop.f32.mrf.mxu0 }
 0x4d6   :  { %v780_v10 = vpop.f32.mrf.mxu0 }
 0x4d7   :  { %v784_v11 = vmul.f32 0.35355338, %v780_v10 }
 0x4d8   :  { %v4633_v13 = vpop.f32.mrf.mxu0 }
 0x4d9   :  { %v785_v14 = vadd.f32 %v784_v11, %v5123_v26 }
 0x4db   :  { %v866_v15 = vsel %vm225_vm2, %v785_v14, -inf }
 0x4dc   :  { %867 = vmax.xlane.f32.xlu0 %v866_v15 }
 0x4f2   :  { %v879_v16 = vpop.xlane.xlu1 %878  ;;  %888 = vrot.lane.b32.xlu0 %v5102_v22, %s5014_s20 }
 0x4f3   :  { %v880_v19 = vsub.f32 %v865_v6, %v879_v16 }
 0x4f5   :  { %v881_v20 = vmul.f32 1.442695, %v880_v19 }
 0x4f6   :  { %1270 = vrot.lane.b32.xlu0 %v5100_v21, %s5018_s26 }
 0x4f7   :  { %4897 = vpow2.f32 %v881_v20 }
 0x504   :  { %v4898_v23 = vpop.eup %4897 }
 0x505   :  { %v883_v24 = vsel %vm225_vm2, %v4898_v23, 0.0 }
 0x506   :  { %884 = vadd.xlane.f32.xlu1 %v883_v24 }
 0x565   :  { %v868_v25 = vpop.xlane.xlu0 %867 }
 0x566   :  { %v869_v27 = vsub.f32 %v785_v14, %v868_v25 }
 0x568   :  { %v870_v28 = vmul.f32 1.442695, %v869_v27  ;;  %v5257_v27 = vld [vmem:[#allocation2 + $0x70] sm:$0xff] }
 0x569   :  { %v889_v29 = vpop.permute.xlu0 %888 }
 0x56a   :  { %4899 = vpow2.f32 %v870_v28  ;;  %4640 = vmatpush3.msra.mxu0 %v889_v29 }
 0x56b   :  { %4649 = vmatprep.subr.mxu0 %v5010_v12 }
 0x56d   :  { %v1271_v45 = vpop.permute.xlu0 %1270 }
 0x577   :  { %v4900_v30 = vpop.eup %4899 }
 0x578   :  { %v872_v31 = vsel %vm225_vm2, %v4900_v30, 0.0 }
 0x579   :  { %873 = vadd.xlane.f32.xlu1 %v872_v31 }
 0x58a   :  { %964 = vrot.lane.b32.xlu1 %v5100_v21, %s5019_s27 }
 0x58e   :  { %1272 = vrot.lane.b32.xlu1 %v5100_v21, %s5020_s4 }
 0x58f   :  { %v885_v33 = vpop.xlane.xlu1 %884 }
 0x590   :  { %4901 = vrcp.f32 %v885_v33 }
 0x592   :  { %1192 = vrot.lane.b32.xlu1 %v5102_v22, %s5021_s28 }
 0x596   :  { %1190 = vrot.lane.b32.xlu1 %v5100_v21, %s5021_s28 }
 0x59d   :  { %v4902_v35 = vpop.eup %4901 }
 0x59e   :  { %v887_v37 = vmul.f32 %v4902_v35, %v4898_v23 }
 0x602   :  { %v874_v34 = vpop.xlane.xlu1 %873 }
 0x603   :  { %4903 = vrcp.f32 %v874_v34 }
 0x606   :  { %v965_v36 = vpop.permute.xlu1 %964 }
 0x607   :  { %4645 = vmatpush3.msra.mxu1 %v965_v36 }
 0x608   :  { %4647 = vmatmul.mubr.msk.f32.vlgmr.msra.gmra.mxu1 %vm225_vm2, %v887_v37  ;;  %4654 = vmatprep.subr.mxu1 %v5010_v12 }
 0x609   :  { %4655 = vmatpush3.msra.mxu1 %v5203_v38  ;;  %4656 = vmatprep.mubr.msk.f32.mxu1 %vm5011_vm1, %v5010_v12 }
 0x60a   :  { %4664 = vmatprep.subr.mxu1 %v5010_v12  ;;  %v1273_v43 = vpop.permute.xlu1 %1272 }
 0x60e   :  { %v1193_v46 = vpop.permute.xlu1 %1192 }
 0x610   :  { %v4904_v39 = vpop.eup %4903 }
 0x611   :  { %v876_v40 = vmul.f32 %v4904_v39, %v4900_v30  ;;  %v5268_v30 = vld [vmem:[#allocation2 + $0x50] sm:$0xff] }
 0x612   :  { %v1191_v49 = vpop.permute.xlu1 %1190 }
 0x613   :  { %4642 = vmatmul.mubr.msk.f32.vlgmr.msra.gmra.mxu0 %vm225_vm2, %v876_v40 }
 0x614   :  { %4651 = vmatprep.mubr.msk.f32.mxu0 %vm5011_vm1, %v5010_v12  ;;  %4650 = vmatpush3.msra.mxu0 %v5214_v41 }
 0x615   :  { %4659 = vmatprep.subr.mxu0 %v5010_v12 }
 0x6c8   :  { %v1036_v42 = vpop.f32.mrf.mxu1 }
 0x6c9   :  { %4657 = vmatmul.mubr.msk.f32.vlgmr.msra.gmra.mxu1 %vm225_vm2, %v1036_v42 }
 0x6ca   :  { %4665 = vmatpush3.xpose.msk.msra.mxu1 %vm225_vm2, %v1273_v43  ;;  %v4648_v44 = vpop.f32.mrf.mxu1  ;;  %4666 = vmatprep.mubr.msk.f32.mxu1 %vm5011_vm1, %v5010_v12 }
 0x6cb   :  { %4674 = vmatprep.subr.mxu1 %v5010_v12 }
 0x6cd   :  { %4667 = vmatmul.mubr.msk.f32.vlgmr.msra.gmra.mxu1 %vm225_vm2, %v1271_v45 }
 0x6ce   :  { %4676 = vmatprep.mubr.msk.f32.mxu1 %vm5011_vm1, %v5010_v12 }
 0x6d3   :  { %v960_v47 = vpop.f32.mrf.mxu0 }
 0x6d4   :  { %4652 = vmatmul.mubr.msk.f32.vlgmr.msra.gmra.mxu0 %vm225_vm2, %v960_v47 }
 0x6d5   :  { %4660 = vmatpush3.xpose.msk.msra.mxu0 %vm225_vm2, %v1193_v46  ;;  %v4643_v48 = vpop.f32.mrf.mxu0  ;;  %4661 = vmatprep.mubr.msk.f32.mxu0 %vm5011_vm1, %v5010_v12 }
 0x6d6   :  { %4669 = vmatprep.subr.mxu0 %v5010_v12 }
 0x6d8   :  { %4662 = vmatmul.mubr.msk.f32.vlgmr.msra.gmra.mxu0 %vm225_vm2, %v1191_v49 }
 0x6d9   :  { %4671 = vmatprep.mubr.msk.f32.mxu0 %vm5011_vm1, %v5010_v12 }
 0x789   :  { %v1185_v50 = vpop.f32.mrf.mxu1 }
 0x78b   :  { %v4658_v52 = vpop.f32.mrf.mxu1 }
 0x78d   :  { %v1344_v53 = vpop.f32.mrf.mxu1 }
 0x78e   :  { %v1348_v54 = vmul.f32 0.35355338, %v1344_v53 }
 0x78f   :  { %v4668_v55 = vpop.f32.mrf.mxu1 }
 0x790   :  { %v1349_v57 = vadd.f32 %v1348_v54, %v5130_v32 }
 0x792   :  { %v1361_v58 = vsel %vm225_vm2, %v1349_v57, -inf }
 0x793   :  { %1362 = vmax.xlane.f32.xlu0 %v1361_v58 }
 0x794   :  { %v1111_v60 = vpop.f32.mrf.mxu0 }
 0x795   :  { %v1115_v61 = vadd.f32 %v1111_v60, %v703_v59 }
 0x796   :  { %v4653_v62 = vpop.f32.mrf.mxu0 }
 0x797   :  { %v5238_v63 = vadd.f32 %v1185_v50, %v1115_v61 }
 0x798   :  { %v1264_v0 = vpop.f32.mrf.mxu0 }
 0x799   :  { %v1268_v2 = vmul.f32 0.35355338, %v1264_v0 }
 0x79a   :  { %v4663_v3 = vpop.f32.mrf.mxu0 }
 0x79b   :  { %v1269_v4 = vadd.f32 %v1268_v2, %v5123_v26 }
 0x79d   :  { %v1350_v5 = vsel %vm225_vm2, %v1269_v4, -inf }
 0x79e   :  { %1351 = vmax.xlane.f32.xlu1 %v1350_v5 }
 0x7af   :  { %1448 = vrot.lane.b32.xlu1 %v5100_v21, %s5022_s29 }
 0x7b3   :  { %1756 = vrot.lane.b32.xlu1 %v5100_v21, %s5023_s30 }
 0x7b7   :  { %1676 = vrot.lane.b32.xlu1 %v5102_v22, %s5024_s7 }
 0x7bb   :  { %1674 = vrot.lane.b32.xlu1 %v5100_v21, %s5024_s7 }
 0x81c   :  { %v1363_v1 = vpop.xlane.xlu0 %1362 }
 0x81d   :  { %v1364_v6 = vsub.f32 %v1349_v57, %v1363_v1 }
 0x81f   :  { %v1365_v7 = vmul.f32 1.442695, %v1364_v6 }
 0x821   :  { %4905 = vpow2.f32 %v1365_v7 }
 0x827   :  { %v1352_v8 = vpop.xlane.xlu1 %1351 }
 0x828   :  { %v1353_v9 = vsub.f32 %v1269_v4, %v1352_v8 }
 0x82a   :  { %v1354_v10 = vmul.f32 1.442695, %v1353_v9  ;;  %v5306_v9 = vld [vmem:[#allocation2 + $0x78] sm:$0xff] }
 0x82b   :  { %v1449_v11 = vpop.permute.xlu1 %1448 }
 0x82c   :  { %4907 = vpow2.f32 %v1354_v10  ;;  %4675 = vmatpush3.msra.mxu1 %v1449_v11  ;;  %v5317_v11 = vld [vmem:[#allocation2 + $0x58] sm:$0xff] }
 0x82d   :  { %4684 = vmatprep.subr.mxu1 %v5010_v12 }
 0x82e   :  { %v4906_v13 = vpop.eup %4905 }
 0x82f   :  { %v1367_v14 = vsel %vm225_vm2, %v4906_v13, 0.0  ;;  %v1757_v33 = vpop.permute.xlu1 %1756 }
 0x830   :  { %1368 = vadd.xlane.f32.xlu0 %v1367_v14 }
 0x833   :  { %v1677_v36 = vpop.permute.xlu1 %1676 }
 0x837   :  { %v1675_v40 = vpop.permute.xlu1 %1674 }
 0x839   :  { %v4908_v15 = vpop.eup %4907 }
 0x83a   :  { %v1356_v16 = vsel %vm225_vm2, %v4908_v15, 0.0 }
 0x83b   :  { %1357 = vadd.xlane.f32.xlu0 %v1356_v16 }
 0x851   :  { %1372 = vrot.lane.b32.xlu0 %v5102_v22, %s5018_s26 }
 0x855   :  { %1754 = vrot.lane.b32.xlu0 %v5100_v21, %s5025_s8 }
 0x8b9   :  { %v1369_v19 = vpop.xlane.xlu0 %1368 }
 0x8ba   :  { %4909 = vrcp.f32 %v1369_v19 }
 0x8c4   :  { %v1358_v20 = vpop.xlane.xlu0 %1357 }
 0x8c5   :  { %4911 = vrcp.f32 %v1358_v20 }
 0x8c7   :  { %v4910_v23 = vpop.eup %4909 }
 0x8c8   :  { %v1373_v24 = vpop.permute.xlu0 %1372  ;;  %v1371_v25 = vmul.f32 %v4910_v23, %v4906_v13 }
 0x8c9   :  { %4670 = vmatpush3.msra.mxu0 %v1373_v24 }
 0x8ca   :  { %4677 = vmatmul.mubr.msk.f32.vlgmr.msra.gmra.mxu1 %vm225_vm2, %v1371_v25  ;;  %4679 = vmatprep.subr.mxu0 %v5010_v12 }
 0x8cb   :  { %4685 = vmatpush3.msra.mxu1 %v5257_v27  ;;  %4686 = vmatprep.mubr.msk.f32.mxu1 %vm5011_vm1, %v5010_v12 }
 0x8cc   :  { %4694 = vmatprep.subr.mxu1 %v5010_v12  ;;  %v1755_v35 = vpop.permute.xlu0 %1754 }
 0x8d2   :  { %v4912_v28 = vpop.eup %4911 }
 0x8d3   :  { %v1360_v29 = vmul.f32 %v4912_v28, %v4908_v15  ;;  %v5342_v28 = vld [vmem:[%s5584_s3 + $0x8] sm:$0xff] }
 0x8d5   :  { %4672 = vmatmul.mubr.msk.f32.vlgmr.msra.gmra.mxu0 %vm225_vm2, %v1360_v29 }
 0x8d6   :  { %4681 = vmatprep.mubr.msk.f32.mxu0 %vm5011_vm1, %v5010_v12  ;;  %4680 = vmatpush3.msra.mxu0 %v5268_v30 }
 0x8d7   :  { %4689 = vmatprep.subr.mxu0 %v5010_v12 }
 0x98a   :  { %v1520_v31 = vpop.f32.mrf.mxu1 }
 0x98b   :  { %4687 = vmatmul.mubr.msk.f32.vlgmr.msra.gmra.mxu1 %vm225_vm2, %v1520_v31 }
 0x98c   :  { %4695 = vmatpush3.xpose.msk.msra.mxu1 %vm225_vm2, %v1757_v33  ;;  %v4678_v34 = vpop.f32.mrf.mxu1  ;;  %4696 = vmatprep.mubr.msk.f32.mxu1 %vm5011_vm1, %v5010_v12 }
 0x98d   :  { %4704 = vmatprep.subr.mxu1 %v5010_v12 }
 0x98f   :  { %4697 = vmatmul.mubr.msk.f32.vlgmr.msra.gmra.mxu1 %vm225_vm2, %v1755_v35 }
 0x990   :  { %4706 = vmatprep.mubr.msk.f32.mxu1 %vm5011_vm1, %v5010_v12 }
 0x995   :  { %v1444_v37 = vpop.f32.mrf.mxu0 }
 0x996   :  { %4682 = vmatmul.mubr.msk.f32.vlgmr.msra.gmra.mxu0 %vm225_vm2, %v1444_v37 }
 0x997   :  { %4690 = vmatpush3.xpose.msk.msra.mxu0 %vm225_vm2, %v1677_v36  ;;  %v4673_v39 = vpop.f32.mrf.mxu0  ;;  %4691 = vmatprep.mubr.msk.f32.mxu0 %vm5011_vm1, %v5010_v12 }
 0x998   :  { %4699 = vmatprep.subr.mxu0 %v5010_v12 }
 0x99a   :  { %4692 = vmatmul.mubr.msk.f32.vlgmr.msra.gmra.mxu0 %vm225_vm2, %v1675_v40 }
 0x99b   :  { %4701 = vmatprep.mubr.msk.f32.mxu0 %vm5011_vm1, %v5010_v12 }
 0xa4b   :  { %v1669_v42 = vpop.f32.mrf.mxu1 }
 0xa4d   :  { %v4688_v43 = vpop.f32.mrf.mxu1 }
 0xa4f   :  { %v1828_v44 = vpop.f32.mrf.mxu1 }
 0xa50   :  { %v1832_v45 = vmul.f32 0.35355338, %v1828_v44 }
 0xa51   :  { %v4698_v46 = vpop.f32.mrf.mxu1 }
 0xa52   :  { %v1833_v47 = vadd.f32 %v1832_v45, %v5130_v32 }
 0xa54   :  { %v1845_v48 = vsel %vm225_vm2, %v1833_v47, -inf }
 0xa55   :  { %1846 = vmax.xlane.f32.xlu0 %v1845_v48 }
 0xa56   :  { %v1595_v49 = vpop.f32.mrf.mxu0 }
 0xa57   :  { %v1599_v50 = vadd.f32 %v1595_v49, %v5238_v63 }
 0xa58   :  { %v4683_v52 = vpop.f32.mrf.mxu0 }
 0xa59   :  { %v5291_v53 = vadd.f32 %v1669_v42, %v1599_v50  ;;  %v5352_v42 = vld [vmem:[%s5583_s2 + $0x8] sm:$0xff] }
 0xa5a   :  { %v1748_v54 = vpop.f32.mrf.mxu0 }
 0xa5b   :  { %v1752_v55 = vmul.f32 0.35355338, %v1748_v54 }
 0xa5c   :  { %v4693_v57 = vpop.f32.mrf.mxu0 }
 0xa5d   :  { %v1753_v58 = vadd.f32 %v1752_v55, %v5123_v26 }
 0xa5f   :  { %v1834_v59 = vsel %vm225_vm2, %v1753_v58, -inf }
 0xa60   :  { %1835 = vmax.xlane.f32.xlu1 %v1834_v59 }
 0xa71   :  { %1932 = vrot.lane.b32.xlu1 %v5100_v21, %s5009_s25 }
 0xa75   :  { %2240 = vrot.lane.b32.xlu1 %v5096_v17, %s5012_s14 }
 0xa79   :  { %2238 = vrot.lane.b32.xlu1 %v5096_v17, %s5013_s15 }
 0xade   :  { %v1847_v32 = vpop.xlane.xlu0 %1846 }
 0xadf   :  { %v1848_v60 = vsub.f32 %v1833_v47, %v1847_v32 }
 0xae1   :  { %v1849_v61 = vmul.f32 1.442695, %v1848_v60 }
 0xae3   :  { %4913 = vpow2.f32 %v1849_v61 }
 0xae9   :  { %v1836_v62 = vpop.xlane.xlu1 %1835 }
 0xaea   :  { %v1837_v63 = vsub.f32 %v1753_v58, %v1836_v62 }
 0xaec   :  { %v1838_v0 = vmul.f32 1.442695, %v1837_v63 }
 0xaed   :  { %v1933_v26 = vpop.permute.xlu1 %1932 }
 0xaee   :  { %4915 = vpow2.f32 %v1838_v0  ;;  %4705 = vmatpush3.msra.mxu1 %v1933_v26 }
 0xaef   :  { %4714 = vmatprep.subr.mxu1 %v5010_v12 }
 0xaf0   :  { %v4914_v2 = vpop.eup %4913 }
 0xaf1   :  { %v1851_v21 = vsel %vm225_vm2, %v4914_v2, 0.0  ;;  %v2241_v13 = vpop.permute.xlu1 %2240 }
 0xaf2   :  { %1852 = vadd.xlane.f32.xlu0 %v1851_v21 }
 0xaf5   :  { %v2239_v16 = vpop.permute.xlu1 %2238 }
 0xafb   :  { %v4916_v3 = vpop.eup %4915 }
 0xafc   :  { %v1840_v4 = vsel %vm225_vm2, %v4916_v3, 0.0 }
 0xafd   :  { %1841 = vadd.xlane.f32.xlu0 %v1840_v4 }
 0xb13   :  { %1856 = vrot.lane.b32.xlu0 %v5102_v22, %s5025_s8 }
 0xb7b   :  { %v1853_v5 = vpop.xlane.xlu0 %1852 }
 0xb7c   :  { %4917 = vrcp.f32 %v1853_v5 }
 0xb86   :  { %v1842_v1 = vpop.xlane.xlu0 %1841 }
 0xb87   :  { %4919 = vrcp.f32 %v1842_v1 }
 0xb89   :  { %v4918_v6 = vpop.eup %4917 }
 0xb8a   :  { %v1857_v7 = vpop.permute.xlu0 %1856  ;;  %v1855_v8 = vmul.f32 %v4918_v6, %v4914_v2 }
 0xb8b   :  { %4700 = vmatpush3.msra.mxu0 %v1857_v7 }
 0xb8c   :  { %4707 = vmatmul.mubr.msk.f32.vlgmr.msra.gmra.mxu1 %vm225_vm2, %v1855_v8  ;;  %4709 = vmatprep.subr.mxu0 %v5010_v12 }
 0xb8d   :  { %4715 = vmatpush3.msra.mxu1 %v5306_v9  ;;  %4716 = vmatprep.mubr.msk.f32.mxu1 %vm5011_vm1, %v5010_v12 }
 0xb8e   :  { %4724 = vmatprep.subr.mxu1 %v5010_v12 }
 0xb94   :  { %v4920_v22 = vpop.eup %4919 }
 0xb95   :  { %v1844_v10 = vmul.f32 %v4920_v22, %v4916_v3 }
 0xb97   :  { %4702 = vmatmul.mubr.msk.f32.vlgmr.msra.gmra.mxu0 %vm225_vm2, %v1844_v10 }
 0xb98   :  { %4711 = vmatprep.mubr.msk.f32.mxu0 %vm5011_vm1, %v5010_v12  ;;  %4710 = vmatpush3.msra.mxu0 %v5317_v11 }
 0xb99   :  { %4719 = vmatprep.subr.mxu0 %v5010_v12 }
 0xc4c   :  { %v2004_v14 = vpop.f32.mrf.mxu1 }
 0xc4d   :  { %4717 = vmatmul.mubr.msk.f32.vlgmr.msra.gmra.mxu1 %vm225_vm2, %v2004_v14 }
 0xc4e   :  { %4725 = vmatpush3.xpose.msk.msra.mxu1 %vm225_vm2, %v2241_v13  ;;  %v4708_v15 = vpop.f32.mrf.mxu1  ;;  %4726 = vmatprep.mubr.msk.f32.mxu1 %vm5011_vm1, %v5010_v12 }
 0xc4f   :  { %4734 = vmatprep.subr.mxu1 %v5010_v12 }
 0xc51   :  { %4727 = vmatmul.mubr.msk.f32.vlgmr.msra.gmra.mxu1 %vm225_vm2, %v2239_v16 }
 0xc52   :  { %4736 = vmatprep.mubr.msk.f32.mxu1 %vm5011_vm1, %v5010_v12 }
 0xc57   :  { %v1928_v19 = vpop.f32.mrf.mxu0 }
 0xc58   :  { %4712 = vmatmul.mubr.msk.f32.vlgmr.msra.gmra.mxu0 %vm225_vm2, %v1928_v19 }
 0xc59   :  { %4720 = vmatpush3.xpose.msk.msra.mxu0 %vm225_vm2, %v5098_v18  ;;  %v4703_v20 = vpop.f32.mrf.mxu0  ;;  %4721 = vmatprep.mubr.msk.f32.mxu0 %vm5011_vm1, %v5010_v12 }
 0xc5a   :  { %4729 = vmatprep.subr.mxu0 %v5010_v12 }
 0xc5c   :  { %4722 = vmatmul.mubr.msk.f32.vlgmr.msra.gmra.mxu0 %vm225_vm2, %v5096_v17 }
 0xc5d   :  { %4731 = vmatprep.mubr.msk.f32.mxu0 %vm5011_vm1, %v5010_v12 }
 0xd0d   :  { %v2153_v23 = vpop.f32.mrf.mxu1 }
 0xd0f   :  { %v4718_v24 = vpop.f32.mrf.mxu1 }
 0xd11   :  { %v2312_v25 = vpop.f32.mrf.mxu1 }
 0xd12   :  { %v2316_v29 = vmul.f32 0.35355338, %v2312_v25 }
 0xd13   :  { %v4728_v31 = vpop.f32.mrf.mxu1 }
 0xd14   :  { %v2317_v33 = vadd.f32 %v2316_v29, %v5342_v28 }
 0xd16   :  { %v2329_v34 = vsel %vm225_vm2, %v2317_v33, -inf }
 0xd17   :  { %2330 = vmax.xlane.f32.xlu0 %v2329_v34 }
 0xd18   :  { %v2079_v35 = vpop.f32.mrf.mxu0 }
 0xd19   :  { %v2083_v36 = vadd.f32 %v2079_v35, %v5291_v53 }
 0xd1a   :  { %v4713_v37 = vpop.f32.mrf.mxu0 }
 0xd1b   :  { %v5347_v39 = vadd.f32 %v2153_v23, %v2083_v36 }
 0xd1c   :  { %v2232_v40 = vpop.f32.mrf.mxu0 }
 0xd1d   :  { %v2236_v43 = vmul.f32 0.35355338, %v2232_v40 }
 0xd1e   :  { %v4723_v44 = vpop.f32.mrf.mxu0 }
 0xd1f   :  { %v2237_v45 = vadd.f32 %v2236_v43, %v5352_v42 }
 0xd21   :  { %v2318_v46 = vsel %vm225_vm2, %v2237_v45, -inf }
 0xd22   :  { %2319 = vmax.xlane.f32.xlu1 %v2318_v46 }
 0xd33   :  { %2416 = vrot.lane.b32.xlu1 %v5096_v17, %s5015_s21 }
 0xd37   :  { %2640 = vrot.lane.b32.xlu1 %v5098_v18, %s5017_s23 }
 0xd3b   :  { %2720 = vrot.lane.b32.xlu1 %v5096_v17, %s5016_s22 }
 0xd3f   :  { %2718 = vrot.lane.b32.xlu1 %v5096_v17, %s5014_s20 }
 0xda0   :  { %v2331_v47 = vpop.xlane.xlu0 %2330 }
 0xda1   :  { %v2332_v48 = vsub.f32 %v2317_v33, %v2331_v47 }
 0xda3   :  { %v2333_v49 = vmul.f32 1.442695, %v2332_v48 }
 0xda5   :  { %4921 = vpow2.f32 %v2333_v49 }
 0xdab   :  { %v2320_v50 = vpop.xlane.xlu1 %2319 }
 0xdac   :  { %v2321_v52 = vsub.f32 %v2237_v45, %v2320_v50 }
 0xdae   :  { %v2322_v53 = vmul.f32 1.442695, %v2321_v52 }
 0xdaf   :  { %v2417_v54 = vpop.permute.xlu1 %2416 }
 0xdb0   :  { %4923 = vpow2.f32 %v2322_v53  ;;  %4735 = vmatpush3.msra.mxu1 %v2417_v54 }
 0xdb1   :  { %4744 = vmatprep.subr.mxu1 %v5010_v12 }
 0xdb2   :  { %v4922_v55 = vpop.eup %4921 }
 0xdb3   :  { %v2335_v57 = vsel %vm225_vm2, %v4922_v55, 0.0  ;;  %v2641_v21 = vpop.permute.xlu1 %2640 }
 0xdb4   :  { %2336 = vadd.xlane.f32.xlu0 %v2335_v57 }
 0xdbd   :  { %v4924_v58 = vpop.eup %4923 }
 0xdbe   :  { %v2324_v59 = vsel %vm225_vm2, %v4924_v58, 0.0 }
 0xdbf   :  { %2325 = vadd.xlane.f32.xlu0 %v2324_v59 }
 0xdd5   :  { %2340 = vrot.lane.b32.xlu0 %v5098_v18, %s5013_s15 }
 0xdd9   :  { %2638 = vrot.lane.b32.xlu0 %v5096_v17, %s5017_s23 }
 0xe3d   :  { %v2337_v32 = vpop.xlane.xlu0 %2336 }
 0xe3e   :  { %4925 = vrcp.f32 %v2337_v32 }
 0xe48   :  { %v2326_v60 = vpop.xlane.xlu0 %2325 }
 0xe49   :  { %4927 = vrcp.f32 %v2326_v60 }
 0xe4b   :  { %v4926_v61 = vpop.eup %4925 }
 0xe4c   :  { %v2341_v62 = vpop.permute.xlu0 %2340  ;;  %v2339_v63 = vmul.f32 %v4926_v61, %v4922_v55 }
 0xe4d   :  { %4730 = vmatpush3.msra.mxu0 %v2341_v62 }
 0xe4e   :  { %4737 = vmatmul.mubr.msk.f32.vlgmr.msra.gmra.mxu1 %vm225_vm2, %v2339_v63  ;;  %4739 = vmatprep.subr.mxu0 %v5010_v12 }
 0xe4f   :  { %4745 = vmatpush3.msra.mxu1 %v5157_v56  ;;  %4746 = vmatprep.mubr.msk.f32.mxu1 %vm5011_vm1, %v5010_v12 }
 0xe50   :  { %4754 = vmatprep.subr.mxu1 %v5010_v12  ;;  %v2639_v3 = vpop.permute.xlu0 %2638 }
 0xe56   :  { %v4928_v0 = vpop.eup %4927 }
 0xe57   :  { %v2328_v26 = vmul.f32 %v4928_v0, %v4924_v58 }
 0xe59   :  { %4732 = vmatmul.mubr.msk.f32.vlgmr.msra.gmra.mxu0 %vm225_vm2, %v2328_v26 }
 0xe5a   :  { %4740 = vmatpush3.msra.mxu0 %v5152_v51  ;;  %4741 = vmatprep.mubr.msk.f32.mxu0 %vm5011_vm1, %v5010_v12  ;;  %v2721_v51 = vpop.permute.xlu1 %2720 }
 0xe5b   :  { %4749 = vmatprep.subr.mxu0 %v5010_v12 }
 0xe5e   :  { %v2719_v1 = vpop.permute.xlu1 %2718 }
 0xf0e   :  { %v2488_v2 = vpop.f32.mrf.mxu1 }
 0xf0f   :  { %4742 = vmatmul.mubr.msk.f32.vlgmr.msra.gmra.mxu0 %vm225_vm2, %v2488_v2 }
 0xf10   :  { %4750 = vmatpush3.xpose.msk.msra.mxu0 %vm225_vm2, %v2641_v21  ;;  %v4738_v56 = vpop.f32.mrf.mxu1  ;;  %4751 = vmatprep.mubr.msk.f32.mxu0 %vm5011_vm1, %v5010_v12 }
 0xf11   :  { %4759 = vmatprep.subr.mxu0 %v5010_v12 }
 0xf13   :  { %4752 = vmatmul.mubr.msk.f32.vlgmr.msra.gmra.mxu0 %vm225_vm2, %v2639_v3 }
 0xf14   :  { %4761 = vmatprep.mubr.msk.f32.mxu0 %vm5011_vm1, %v5010_v12 }
 0xf19   :  { %v2412_v4 = vpop.f32.mrf.mxu0 }
 0xf1a   :  { %4747 = vmatmul.mubr.msk.f32.vlgmr.msra.gmra.mxu1 %vm225_vm2, %v2412_v4 }
 0xf1b   :  { %4755 = vmatpush3.xpose.msk.msra.mxu1 %vm225_vm2, %v2721_v51  ;;  %v4733_v5 = vpop.f32.mrf.mxu0  ;;  %4756 = vmatprep.mubr.msk.f32.mxu1 %vm5011_vm1, %v5010_v12 }
 0xf1c   :  { %4764 = vmatprep.subr.mxu1 %v5010_v12 }
 0xf1e   :  { %4757 = vmatmul.mubr.msk.f32.vlgmr.msra.gmra.mxu1 %vm225_vm2, %v2719_v1 }
 0xf1f   :  { %4766 = vmatprep.mubr.msk.f32.mxu1 %vm5011_vm1, %v5010_v12 }
 0xfcf   :  { %v2561_v6 = vpop.f32.mrf.mxu0 }
 0xfd1   :  { %v4743_v7 = vpop.f32.mrf.mxu0 }
 0xfd3   :  { %v2712_v8 = vpop.f32.mrf.mxu0 }
 0xfd4   :  { %v2716_v22 = vmul.f32 0.35355338, %v2712_v8 }
 0xfd5   :  { %v4753_v10 = vpop.f32.mrf.mxu0 }
 0xfd6   :  { %v2717_v13 = vadd.f32 %v2716_v22, %v5352_v42 }
 0xfd8   :  { %v2798_v14 = vsel %vm225_vm2, %v2717_v13, -inf }
 0xfd9   :  { %2799 = vmax.xlane.f32.xlu0 %v2798_v14 }
 0xfda   :  { %v2634_v15 = vpop.f32.mrf.mxu1 }
 0xfdb   :  { %v5400_v16 = vadd.f32 %v2634_v15, %v2561_v6 }
 0xfdc   :  { %v4748_v19 = vpop.f32.mrf.mxu1 }
 0xfde   :  { %v2792_v20 = vpop.f32.mrf.mxu1 }
 0xfdf   :  { %v2796_v23 = vmul.f32 0.35355338, %v2792_v20 }
 0xfe0   :  { %v4758_v24 = vpop.f32.mrf.mxu1 }
 0xfe1   :  { %v2797_v25 = vadd.f32 %v2796_v23, %v5342_v28 }
 0xfe3   :  { %v2809_v29 = vsel %vm225_vm2, %v2797_v25, -inf }
 0xfe4   :  { %2810 = vmax.xlane.f32.xlu1 %v2809_v29 }
 0xff5   :  { %2820 = vrot.lane.b32.xlu1 %v5098_v18, %s5014_s20 }
 0xff9   :  { %3122 = vrot.lane.b32.xlu1 %v5098_v18, %s5021_s28 }
 0xffd   :  { %3202 = vrot.lane.b32.xlu1 %v5096_v17, %s5020_s4 }
0x1001   :  { %3200 = vrot.lane.b32.xlu1 %v5096_v17, %s5018_s26 }
0x1062   :  { %v2800_v31 = vpop.xlane.xlu0 %2799 }
0x1063   :  { %v2801_v33 = vsub.f32 %v2717_v13, %v2800_v31 }
0x1065   :  { %v2802_v34 = vmul.f32 1.442695, %v2801_v33 }
0x1067   :  { %4929 = vpow2.f32 %v2802_v34 }
0x106d   :  { %v2811_v35 = vpop.xlane.xlu1 %2810 }
0x106e   :  { %v2812_v36 = vsub.f32 %v2797_v25, %v2811_v35 }
0x1070   :  { %v2813_v37 = vmul.f32 1.442695, %v2812_v36 }
0x1071   :  { %v2821_v40 = vpop.permute.xlu1 %2820 }
0x1072   :  { %4931 = vpow2.f32 %v2813_v37  ;;  %4760 = vmatpush3.msra.mxu0 %v2821_v40 }
0x1073   :  { %4769 = vmatprep.subr.mxu0 %v5010_v12 }
0x1074   :  { %v4930_v43 = vpop.eup %4929 }
0x1075   :  { %v2804_v44 = vsel %vm225_vm2, %v4930_v43, 0.0  ;;  %v3123_v57 = vpop.permute.xlu1 %3122 }
0x1076   :  { %2805 = vadd.xlane.f32.xlu0 %v2804_v44 }
0x107f   :  { %v4932_v45 = vpop.eup %4931 }
0x1080   :  { %v2815_v46 = vsel %vm225_vm2, %v4932_v45, 0.0 }
0x1081   :  { %2816 = vadd.xlane.f32.xlu0 %v2815_v46 }
0x1097   :  { %2896 = vrot.lane.b32.xlu0 %v5096_v17, %s5019_s27 }
0x109b   :  { %3120 = vrot.lane.b32.xlu0 %v5096_v17, %s5021_s28 }
0x10ff   :  { %v2806_v47 = vpop.xlane.xlu0 %2805 }
0x1100   :  { %4933 = vrcp.f32 %v2806_v47 }
0x110a   :  { %v2817_v48 = vpop.xlane.xlu0 %2816 }
0x110b   :  { %4935 = vrcp.f32 %v2817_v48 }
0x110d   :  { %v4934_v49 = vpop.eup %4933 }
0x110e   :  { %v2897_v50 = vpop.permute.xlu0 %2896  ;;  %v2808_v52 = vmul.f32 %v4934_v49, %v4930_v43 }
0x110f   :  { %4765 = vmatpush3.msra.mxu1 %v2897_v50 }
0x1110   :  { %4762 = vmatmul.mubr.msk.f32.vlgmr.msra.gmra.mxu0 %vm225_vm2, %v2808_v52  ;;  %4774 = vmatprep.subr.mxu1 %v5010_v12 }
0x1111   :  { %4770 = vmatpush3.msra.mxu0 %v5214_v41  ;;  %4771 = vmatprep.mubr.msk.f32.mxu0 %vm5011_vm1, %v5010_v12 }
0x1112   :  { %4779 = vmatprep.subr.mxu0 %v5010_v12  ;;  %v3121_v58 = vpop.permute.xlu0 %3120 }
0x1118   :  { %v4936_v53 = vpop.eup %4935 }
0x1119   :  { %v2819_v54 = vmul.f32 %v4936_v53, %v4932_v45 }
0x111b   :  { %4767 = vmatmul.mubr.msk.f32.vlgmr.msra.gmra.mxu1 %vm225_vm2, %v2819_v54 }
0x111c   :  { %4775 = vmatpush3.msra.mxu1 %v5203_v38  ;;  %4776 = vmatprep.mubr.msk.f32.mxu1 %vm5011_vm1, %v5010_v12  ;;  %v3203_v38 = vpop.permute.xlu1 %3202 }
0x111d   :  { %4784 = vmatprep.subr.mxu1 %v5010_v12 }
0x1120   :  { %v3201_v60 = vpop.permute.xlu1 %3200 }
0x11d0   :  { %v2892_v55 = vpop.f32.mrf.mxu0 }
0x11d1   :  { %4772 = vmatmul.mubr.msk.f32.vlgmr.msra.gmra.mxu0 %vm225_vm2, %v2892_v55 }
0x11d2   :  { %4780 = vmatpush3.xpose.msk.msra.mxu0 %vm225_vm2, %v3123_v57  ;;  %v4763_v41 = vpop.f32.mrf.mxu0  ;;  %4781 = vmatprep.mubr.msk.f32.mxu0 %vm5011_vm1, %v5010_v12 }
0x11d3   :  { %4789 = vmatprep.subr.mxu0 %v5010_v12 }
0x11d5   :  { %4782 = vmatmul.mubr.msk.f32.vlgmr.msra.gmra.mxu0 %vm225_vm2, %v3121_v58 }
0x11d6   :  { %4791 = vmatprep.mubr.msk.f32.mxu0 %vm5011_vm1, %v5010_v12 }
0x11db   :  { %v2968_v59 = vpop.f32.mrf.mxu1 }
0x11dc   :  { %4777 = vmatmul.mubr.msk.f32.vlgmr.msra.gmra.mxu1 %vm225_vm2, %v2968_v59 }
0x11dd   :  { %4785 = vmatpush3.xpose.msk.msra.mxu1 %vm225_vm2, %v3203_v38  ;;  %v4768_v32 = vpop.f32.mrf.mxu1  ;;  %4786 = vmatprep.mubr.msk.f32.mxu1 %vm5011_vm1, %v5010_v12 }
0x11de   :  { %4794 = vmatprep.subr.mxu1 %v5010_v12 }
0x11e0   :  { %4787 = vmatmul.mubr.msk.f32.vlgmr.msra.gmra.mxu1 %vm225_vm2, %v3201_v60 }
0x11e1   :  { %4796 = vmatprep.mubr.msk.f32.mxu1 %vm5011_vm1, %v5010_v12 }
0x1291   :  { %v3041_v61 = vpop.f32.mrf.mxu0 }
0x1292   :  { %v3045_v62 = vadd.f32 %v3041_v61, %v5400_v16 }
0x1293   :  { %v4773_v63 = vpop.f32.mrf.mxu0 }
0x1295   :  { %v3194_v0 = vpop.f32.mrf.mxu0 }
0x1296   :  { %v3198_v26 = vmul.f32 0.35355338, %v3194_v0 }
0x1297   :  { %v4783_v2 = vpop.f32.mrf.mxu0 }
0x1298   :  { %v3199_v21 = vadd.f32 %v3198_v26, %v5352_v42  ;;  %v4961_v26 = vld [vmem:[%s5581_s0] sm:$0xff] }
0x129a   :  { %v3280_v56 = vsel %vm225_vm2, %v3199_v21, -inf }
0x129b   :  { %3281 = vmax.xlane.f32.xlu0 %v3280_v56 }
0x129c   :  { %v3115_v3 = vpop.f32.mrf.mxu1 }
0x129d   :  { %v5449_v51 = vadd.f32 %v3115_v3, %v3045_v62 }
0x129e   :  { %v4778_v4 = vpop.f32.mrf.mxu1 }
0x12a0   :  { %v3274_v5 = vpop.f32.mrf.mxu1 }
0x12a1   :  { %v3278_v1 = vmul.f32 0.35355338, %v3274_v5 }
0x12a2   :  { %v4788_v6 = vpop.f32.mrf.mxu1 }
0x12a3   :  { %v3279_v7 = vadd.f32 %v3278_v1, %v5342_v28 }
0x12a5   :  { %v3291_v8 = vsel %vm225_vm2, %v3279_v7, -inf }
0x12a6   :  { %3292 = vmax.xlane.f32.xlu1 %v3291_v8 }
0x12b7   :  { %3302 = vrot.lane.b32.xlu1 %v5098_v18, %s5018_s26 }
0x12bb   :  { %3604 = vrot.lane.b32.xlu1 %v5098_v18, %s5024_s7 }
0x12bf   :  { %3684 = vrot.lane.b32.xlu1 %v5096_v17, %s5023_s30 }
0x12c3   :  { %3682 = vrot.lane.b32.xlu1 %v5096_v17, %s5025_s8 }
0x1324   :  { %v3282_v22 = vpop.xlane.xlu0 %3281 }
0x1325   :  { %v3283_v10 = vsub.f32 %v3199_v21, %v3282_v22 }
0x1327   :  { %v3284_v13 = vmul.f32 1.442695, %v3283_v10 }
0x1329   :  { %4937 = vpow2.f32 %v3284_v13 }
0x132f   :  { %v3293_v14 = vpop.xlane.xlu1 %3292 }
0x1330   :  { %v3294_v15 = vsub.f32 %v3279_v7, %v3293_v14 }
0x1332   :  { %v3295_v16 = vmul.f32 1.442695, %v3294_v15 }
0x1333   :  { %v3303_v19 = vpop.permute.xlu1 %3302 }
0x1334   :  { %4939 = vpow2.f32 %v3295_v16  ;;  %4790 = vmatpush3.msra.mxu0 %v3303_v19 }
0x1335   :  { %4799 = vmatprep.subr.mxu0 %v5010_v12 }
0x1336   :  { %v4938_v20 = vpop.eup %4937 }
0x1337   :  { %v3286_v23 = vsel %vm225_vm2, %v4938_v20, 0.0  ;;  %v3605_v43 = vpop.permute.xlu1 %3604 }
0x1338   :  { %3287 = vadd.xlane.f32.xlu0 %v3286_v23 }
0x1341   :  { %v4940_v24 = vpop.eup %4939 }
0x1342   :  { %v3297_v25 = vsel %vm225_vm2, %v4940_v24, 0.0 }
0x1343   :  { %3298 = vadd.xlane.f32.xlu0 %v3297_v25 }
0x1359   :  { %3378 = vrot.lane.b32.xlu0 %v5096_v17, %s5022_s29 }
0x135d   :  { %3602 = vrot.lane.b32.xlu0 %v5096_v17, %s5024_s7 }
0x13c1   :  { %v3288_v29 = vpop.xlane.xlu0 %3287 }
0x13c2   :  { %4941 = vrcp.f32 %v3288_v29 }
0x13cc   :  { %v3299_v31 = vpop.xlane.xlu0 %3298 }
0x13cd   :  { %4943 = vrcp.f32 %v3299_v31 }
0x13cf   :  { %v4942_v33 = vpop.eup %4941 }
0x13d0   :  { %v3379_v34 = vpop.permute.xlu0 %3378  ;;  %v3290_v35 = vmul.f32 %v4942_v33, %v4938_v20 }
0x13d1   :  { %4795 = vmatpush3.msra.mxu1 %v3379_v34 }
0x13d2   :  { %4792 = vmatmul.mubr.msk.f32.vlgmr.msra.gmra.mxu0 %vm225_vm2, %v3290_v35  ;;  %4804 = vmatprep.subr.mxu1 %v5010_v12 }
0x13d3   :  { %4800 = vmatpush3.msra.mxu0 %v5268_v30  ;;  %4801 = vmatprep.mubr.msk.f32.mxu0 %vm5011_vm1, %v5010_v12 }
0x13d4   :  { %4809 = vmatprep.subr.mxu0 %v5010_v12  ;;  %v3603_v44 = vpop.permute.xlu0 %3602 }
0x13da   :  { %v4944_v36 = vpop.eup %4943 }
0x13db   :  { %v3301_v37 = vmul.f32 %v4944_v36, %v4940_v24 }
0x13dd   :  { %4797 = vmatmul.mubr.msk.f32.vlgmr.msra.gmra.mxu1 %vm225_vm2, %v3301_v37 }
0x13de   :  { %4805 = vmatpush3.msra.mxu1 %v5257_v27  ;;  %4806 = vmatprep.mubr.msk.f32.mxu1 %vm5011_vm1, %v5010_v12  ;;  %v3685_v27 = vpop.permute.xlu1 %3684 }
0x13df   :  { %4814 = vmatprep.subr.mxu1 %v5010_v12 }
0x13e2   :  { %v3683_v47 = vpop.permute.xlu1 %3682 }
0x1492   :  { %v3374_v40 = vpop.f32.mrf.mxu0 }
0x1493   :  { %4802 = vmatmul.mubr.msk.f32.vlgmr.msra.gmra.mxu0 %vm225_vm2, %v3374_v40 }
0x1494   :  { %4810 = vmatpush3.xpose.msk.msra.mxu0 %vm225_vm2, %v3605_v43  ;;  %v4793_v30 = vpop.f32.mrf.mxu0  ;;  %4811 = vmatprep.mubr.msk.f32.mxu0 %vm5011_vm1, %v5010_v12 }
0x1495   :  { %4819 = vmatprep.subr.mxu0 %v5010_v12 }
0x1497   :  { %4812 = vmatmul.mubr.msk.f32.vlgmr.msra.gmra.mxu0 %vm225_vm2, %v3603_v44 }
0x1498   :  { %4821 = vmatprep.mubr.msk.f32.mxu0 %vm5011_vm1, %v5010_v12 }
0x149d   :  { %v3450_v45 = vpop.f32.mrf.mxu1 }
0x149e   :  { %4807 = vmatmul.mubr.msk.f32.vlgmr.msra.gmra.mxu1 %vm225_vm2, %v3450_v45 }
0x149f   :  { %4815 = vmatpush3.xpose.msk.msra.mxu1 %vm225_vm2, %v3685_v27  ;;  %v4798_v46 = vpop.f32.mrf.mxu1  ;;  %4816 = vmatprep.mubr.msk.f32.mxu1 %vm5011_vm1, %v5010_v12 }
0x14a0   :  { %4824 = vmatprep.subr.mxu1 %v5010_v12 }
0x14a2   :  { %4817 = vmatmul.mubr.msk.f32.vlgmr.msra.gmra.mxu1 %vm225_vm2, %v3683_v47 }
0x14a3   :  { %4826 = vmatprep.mubr.msk.f32.mxu1 %vm5011_vm1, %v5010_v12 }
0x1553   :  { %v3523_v48 = vpop.f32.mrf.mxu0 }
0x1554   :  { %v3527_v49 = vadd.f32 %v3523_v48, %v5449_v51 }
0x1555   :  { %v4803_v50 = vpop.f32.mrf.mxu0 }
0x1556   :  { %v4962_v50 = vld [vmem:[%s5581_s0 + $0x8] sm:$0xff] }
0x1557   :  { %v3676_v52 = vpop.f32.mrf.mxu0 }
0x1558   :  { %v3680_v53 = vmul.f32 0.35355338, %v3676_v52 }
0x1559   :  { %v4813_v54 = vpop.f32.mrf.mxu0 }
0x155a   :  { %v3681_v55 = vadd.f32 %v3680_v53, %v5352_v42  ;;  %v5507_v42 = vld [vmem:[%s5586_s5 + $0x2] ss:$0 sm:$0xff] }
0x155b   :  { %v4089_v63 = vadd.f32 %v5507_v42, %v5347_v39 }
0x155c   :  { %v3762_v57 = vsel %vm225_vm2, %v3681_v55, -inf }
0x155d   :  { %3763 = vmax.xlane.f32.xlu0 %v3762_v57  ;;  %v4091_v0 = vmax.f32 %v4089_v63, 0.0  ;;  %v4145_v63 = vld [vmem:[#allocation2 + $0xc0] sm:$0xff] }
0x155e   :  { %v3597_v41 = vpop.f32.mrf.mxu1 }
0x155f   :  { %v5498_v58 = vadd.f32 %v3597_v41, %v3527_v49 }
0x1560   :  { %v4808_v38 = vpop.f32.mrf.mxu1 }
0x1561   :  { %v4139_v38 = vld [vmem:[#allocation2 + $0x98] sm:$0xff] }
0x1562   :  { %v3756_v59 = vpop.f32.mrf.mxu1 }
0x1563   :  { %v3760_v32 = vmul.f32 0.35355338, %v3756_v59  ;;  %v4138_v59 = vld [vmem:[#allocation2 + $0x90] sm:$0xff] }
0x1564   :  { %v4818_v60 = vpop.f32.mrf.mxu1 }
0x1565   :  { %v3761_v61 = vadd.f32 %v3760_v32, %v5342_v28  ;;  %v4095_v28 = vadd.f32 %v4961_v26, %v4091_v0  ;;  %v4137_v32 = vld [vmem:[#allocation2 + $0x88] sm:$0xff]  ;;  %v4136_v60 = vld [vmem:[#allocation2 + $0x80] sm:$0xff] }
0x1567   :  { %v3773_v62 = vsel %vm225_vm2, %v3761_v61, -inf  ;;  %v4097_v2 = vsel %vm55_vm0, %v4095_v28, 0.0 }
0x1568   :  { %3774 = vmax.xlane.f32.xlu1 %v3773_v62  ;;  %v4147_v62 = vld [vmem:[#allocation2 + $0xd0] sm:$0xff] }
0x1579   :  { %3784 = vrot.lane.b32.xlu1 %v5098_v18, %s5025_s8 }
0x159d   :  { %4098 = vadd.xlane.f32.xlu1 %v4097_v2 }
0x15e6   :  { %v3764_v21 = vpop.xlane.xlu0 %3763 }
0x15e7   :  { %v3765_v56 = vsub.f32 %v3681_v55, %v3764_v21 }
0x15e9   :  { %v3766_v18 = vmul.f32 1.442695, %v3765_v56 }
0x15eb   :  { %4945 = vpow2.f32 %v3766_v18 }
0x15f1   :  { %v3775_v3 = vpop.xlane.xlu1 %3774 }
0x15f2   :  { %v3776_v51 = vsub.f32 %v3761_v61, %v3775_v3  ;;  %v4148_v61 = vld [vmem:[#allocation2 + $0xd8] sm:$0xff] }
0x15f3   :  { %v4144_v3 = vld [vmem:[#allocation2 + $0xb8] sm:$0xff] }
0x15f4   :  { %v3777_v4 = vmul.f32 1.442695, %v3776_v51  ;;  %v4143_v51 = vld [vmem:[#allocation2 + $0xb0] sm:$0xff] }
0x15f5   :  { %v3785_v5 = vpop.permute.xlu1 %3784 }
0x15f6   :  { %4947 = vpow2.f32 %v3777_v4  ;;  %4820 = vmatpush3.msra.mxu0 %v3785_v5  ;;  %v4142_v4 = vld [vmem:[#allocation2 + $0xa8] sm:$0xff]  ;;  %v4141_v5 = vld [vmem:[#allocation2 + $0xa0] sm:$0xff] }
0x15f7   :  { %4829 = vmatprep.subr.mxu0 %v5010_v12 }
0x15f8   :  { %v4946_v39 = vpop.eup %4945 }
0x15f9   :  { %v3768_v1 = vsel %vm225_vm2, %v4946_v39, 0.0 }
0x15fa   :  { %3769 = vadd.xlane.f32.xlu0 %v3768_v1 }
0x1603   :  { %v4948_v6 = vpop.eup %4947 }
0x1604   :  { %v3779_v7 = vsel %vm225_vm2, %v4948_v6, 0.0 }
0x1605   :  { %3780 = vadd.xlane.f32.xlu0 %v3779_v7 }
0x161b   :  { %3860 = vrot.lane.b32.xlu0 %v5096_v17, %s5009_s25 }
0x1626   :  { %v4099_v8 = vpop.xlane.xlu1 %4098 }
0x1627   :  { %v4104_v22 = vmul.f32 0.03125, %v4099_v8 }
0x1629   :  { %v4106_v10 = vsub.f32 %v4095_v28, %v4104_v22 }
0x162b   :  { %v4108_v13 = vmul.f32 %v4106_v10, %v4106_v10 }
0x162d   :  { %v4110_v14 = vsel %vm55_vm0, %v4108_v13, 0.0  ;;  %v4450_v13 = vld [vmem:[%s5586_s5 + $0x6] ss:$0 sm:$0xff] }
0x162e   :  { %4111 = vadd.xlane.f32.xlu1 %v4110_v14 }
0x1683   :  { %v3770_v15 = vpop.xlane.xlu0 %3769 }
0x1684   :  { %4949 = vrcp.f32 %v3770_v15 }
0x168e   :  { %v3781_v16 = vpop.xlane.xlu0 %3780 }
0x168f   :  { %4951 = vrcp.f32 %v3781_v16 }
0x1691   :  { %v4950_v19 = vpop.eup %4949 }
0x1692   :  { %v3861_v20 = vpop.permute.xlu0 %3860  ;;  %v3772_v23 = vmul.f32 %v4950_v19, %v4946_v39  ;;  %v4447_v39 = vld [vmem:[%s5586_s5 + $0x5] ss:$0 sm:$0xff] }
0x1693   :  { %4825 = vmatpush3.msra.mxu1 %v3861_v20 }
0x1694   :  { %4822 = vmatmul.mubr.msk.f32.vlgmr.msra.gmra.mxu0 %vm225_vm2, %v3772_v23  ;;  %4834 = vmatprep.subr.mxu1 %v5010_v12 }
0x1695   :  { %4830 = vmatpush3.msra.mxu0 %v5317_v11  ;;  %4831 = vmatprep.mubr.msk.f32.mxu0 %vm5011_vm1, %v5010_v12  ;;  %v5533_v11 = vld [vmem:[%s5586_s5 + $0x3] ss:$0 sm:$0xff] }
0x1696   :  { %4839 = vmatprep.subr.mxu0 %v4139_v38 }
0x169c   :  { %v4952_v17 = vpop.eup %4951 }
0x169d   :  { %v3783_v24 = vmul.f32 %v4952_v17, %v4948_v6 }
0x169f   :  { %4827 = vmatmul.mubr.msk.f32.vlgmr.msra.gmra.mxu1 %vm225_vm2, %v3783_v24 }
0x16a0   :  { %4835 = vmatpush3.msra.mxu1 %v5306_v9  ;;  %4836 = vmatprep.mubr.msk.f32.mxu1 %vm5011_vm1, %v5010_v12  ;;  %v5539_v9 = vld [vmem:[%s5586_s5 + $0x4] ss:$0 sm:$0xff]  ;;  %s5026_s5 = smov [#allocation5]  }
0x16a1   :  { %4850 = vmatprep.subr.mxu1 %v4148_v61  ;;  %s4362_s23 = sshll.u32 %s5026_s5, 4  ;;  %s4363_s23 = int_to_ptr.vmem [resolvable:$true] %s4362_s23 }
0x16a2   :  { %s4983_s26 = scalar_lea.vmem %s4363_s23, 256  ;;  %p4988_p6 = scmp.lt.s32.totalorder %s4363_s23, %s4363_s23 }
0x16a3   :  { %p4984_p5 = scmp.ne.s32.totalorder %s4363_s23, %s4983_s26  ;;  %p4989_p7 = scmp.lt.s32.totalorder %s4983_s26, %s4983_s26 }
0x16a5   :  { %p4990_p8 = por %p4989_p7, %p4988_p6 }
0x16a7   :  { %p4991_p9 = pnand %p4990_p8, %p4984_p5 }
0x16b7   :  { %v4112_v25 = vpop.xlane.xlu1 %4111 }
0x16b8   :  { %v4116_v29 = vmul.f32 0.03125, %v4112_v25 }
0x16ba   :  { %v4118_v31 = vadd.f32 1e-05, %v4116_v29 }
0x16bc   :  { %4953 = vrsqrt.f32 %v4118_v31 }
0x16c9   :  { %v4954_v33 = vpop.eup %4953 }
0x16ca   :  { %v4122_v34 = vmul.f32 %v4954_v33, %v4106_v10 }
0x16cc   :  { %v4128_v35 = vmul.f32 %v5533_v11, %v4122_v34 }
0x16ce   :  { %v5542_v12 = vadd.f32 %v5539_v9, %v4128_v35 }
0x1754   :  { %v3856_v36 = vpop.f32.mrf.mxu0 }
0x1755   :  { %4832 = vmatmul.mubr.msk.f32.vlgmr.msra.gmra.mxu0 %vm225_vm2, %v3856_v36 }
0x1756   :  { %v4823_v37 = vpop.f32.mrf.mxu0  ;;  %4847 = vmatprep.mubr.msk.f32.mxu0 %vm55_vm0, %v5542_v12  ;;  %4840 = vmatpush3.msra.mxu0 %v4139_v38 }
0x1757   :  { %4841 = vmatprep.subr.mxu0 %v4138_v59 }
0x1758   :  { %4842 = vmatpush3.msra.mxu0 %v4138_v59 }
0x1759   :  { %4843 = vmatprep.subr.mxu0 %v4137_v32 }
0x175a   :  { %4844 = vmatpush3.msra.mxu0 %v4137_v32 }
0x175b   :  { %4845 = vmatprep.subr.mxu0 %v4136_v60 }
0x175c   :  { %4846 = vmatpush3.msra.mxu0 %v4136_v60 }
0x175f   :  { %v3932_v40 = vpop.f32.mrf.mxu1 }
0x1760   :  { %4837 = vmatmul.mubr.msk.f32.vlgmr.msra.gmra.mxu1 %vm225_vm2, %v3932_v40 }
0x1761   :  { %v4828_v43 = vpop.f32.mrf.mxu1  ;;  %4851 = vmatpush3.msra.mxu1 %v4148_v61 }
0x1762   :  { %4852 = vmatprep.subr.mxu1 %v4147_v62 }
0x1763   :  { %4853 = vmatpush3.msra.mxu1 %v4147_v62 }
0x1815   :  { %v4005_v30 = vpop.f32.mrf.mxu0 }
0x1816   :  { %v4009_v27 = vadd.f32 %v4005_v30, %v5498_v58 }
0x1817   :  { %v4833_v44 = vpop.f32.mrf.mxu0 }
0x1820   :  { %v4079_v45 = vpop.f32.mrf.mxu1 }
0x1821   :  { %v4083_v46 = vadd.f32 %v4079_v45, %v4009_v27 }
0x1822   :  { %v4838_v47 = vpop.f32.mrf.mxu1 }
0x1823   :  { %v4090_v48 = vadd.f32 %v5507_v42, %v4083_v46  ;;  %v4146_v42 = vld [vmem:[#allocation2 + $0xc8] sm:$0xff] }
0x1824   :  { %4854 = vmatprep.subr.mxu1 %v4146_v42 }
0x1825   :  { %v4092_v49 = vmax.f32 %v4090_v48, 0.0  ;;  %4855 = vmatpush3.msra.mxu1 %v4146_v42 }
0x1826   :  { %4856 = vmatprep.subr.mxu1 %v4145_v63 }
0x1827   :  { %v4096_v52 = vadd.f32 %v4962_v50, %v4092_v49  ;;  %4857 = vmatpush3.msra.mxu1 %v4145_v63 }
0x1828   :  { %4858 = vmatprep.subr.mxu1 %v4144_v3 }
0x1829   :  { %v4100_v53 = vsel %vm55_vm0, %v4096_v52, 0.0  ;;  %4859 = vmatpush3.msra.mxu1 %v4144_v3 }
0x182a   :  { %4101 = vadd.xlane.f32.xlu0 %v4100_v53  ;;  %4860 = vmatprep.subr.mxu1 %v4143_v51 }
0x182b   :  { %4861 = vmatpush3.msra.mxu1 %v4143_v51 }
0x182c   :  { %4862 = vmatprep.subr.mxu1 %v4142_v4 }
0x182d   :  { %4863 = vmatpush3.msra.mxu1 %v4142_v4 }
0x182e   :  { %4864 = vmatprep.subr.mxu1 %v4141_v5 }
0x182f   :  { %4865 = vmatpush3.msra.mxu1 %v4141_v5 }
0x18b3   :  { %v4102_v54 = vpop.xlane.xlu0 %4101 }
0x18b4   :  { %v4105_v55 = vmul.f32 0.03125, %v4102_v54 }
0x18b6   :  { %v4107_v57 = vsub.f32 %v4096_v52, %v4105_v55 }
0x18b8   :  { %v4109_v41 = vmul.f32 %v4107_v57, %v4107_v57 }
0x18ba   :  { %v4113_v58 = vsel %vm55_vm0, %v4109_v41, 0.0 }
0x18bb   :  { %4114 = vadd.xlane.f32.xlu0 %v4113_v58 }
0x1944   :  { %v4115_v0 = vpop.xlane.xlu0 %4114 }
0x1945   :  { %v4117_v26 = vmul.f32 0.03125, %v4115_v0 }
0x1947   :  { %v4119_v28 = vadd.f32 1e-05, %v4117_v26 }
0x1949   :  { %4955 = vrsqrt.f32 %v4119_v28 }
0x1956   :  { %v4956_v2 = vpop.eup %4955 }
0x1957   :  { %v4123_v21 = vmul.f32 %v4956_v2, %v4107_v57 }
0x1959   :  { %v4129_v56 = vmul.f32 %v5533_v11, %v4123_v21 }
0x195b   :  { %v4135_v18 = vadd.f32 %v5539_v9, %v4129_v56 }
0x195d   :  { %4848 = vmatmul.mubr.msk.f32.vlgmr.msra.gmra.mxu0 %vm55_vm0, %v4135_v18 }
0x1a1d   :  { %v4849_v1 = vpop.f32.mrf.mxu0 }
0x1a1e   :  { %v4232_v6 = vadd.f32 %v4849_v1, %v4447_v39 }
0x1a1f   :  { %v4226_v7 = vpop.f32.mrf.mxu0 }
0x1a20   :  { %v4227_v8 = vadd.f32 %v4447_v39, %v4226_v7  ;;  %v4236_v10 = vmax.f32 %v4232_v6, 0.0 }
0x1a22   :  { %v4235_v22 = vmax.f32 %v4227_v8, 0.0 }
0x1a24   :  { %4866 = vmatprep.mubr.msk.f32.mxu1 %vm4241_vm3, %v4235_v22 }
0x1a25   :  { %4867 = vmatmul.mubr.msk.f32.vlgmr.msra.gmra.mxu1 %vm4241_vm3, %v4236_v10 }
0x1ae5   :  { %v4868_v14 = vpop.f32.mrf.mxu1 }
0x1ae6   :  { %v4320_v15 = vadd.f32 %v4868_v14, %v4450_v13 }
0x1ae7   :  { %v4314_v16 = vpop.f32.mrf.mxu1 }
0x1ae8   :  { %v4315_v19 = vadd.f32 %v4450_v13, %v4314_v16  ;;  %v4324_v20 = vadd.f32 %v4320_v15, %v4135_v18 }
0x1aea   :  { %v4328_v23 = vsel %vm55_vm0, %v4324_v20, 0.0  ;;  %v4323_v17 = vadd.f32 %v4315_v19, %v5542_v12 }
0x1aeb   :  { %4329 = vadd.xlane.f32.xlu0 %v4328_v23 }
0x1aec   :  { %v4325_v24 = vsel %vm55_vm0, %v4323_v17, 0.0 }
0x1aed   :  { %4326 = vadd.xlane.f32.xlu1 %v4325_v24 }
0x1b74   :  { %v4330_v25 = vpop.xlane.xlu0 %4329 }
0x1b75   :  { %v4332_v29 = vmul.f32 0.03125, %v4330_v25 }
0x1b76   :  { %v4327_v31 = vpop.xlane.xlu1 %4326 }
0x1b77   :  { %v4334_v33 = vsub.f32 %v4324_v20, %v4332_v29  ;;  %v4331_v34 = vmul.f32 0.03125, %v4327_v31 }
0x1b79   :  { %v4333_v35 = vsub.f32 %v4323_v17, %v4331_v34  ;;  %v4336_v36 = vmul.f32 %v4334_v33, %v4334_v33 }
0x1b7b   :  { %v4340_v37 = vsel %vm55_vm0, %v4336_v36, 0.0  ;;  %v4335_v40 = vmul.f32 %v4333_v35, %v4333_v35 }
0x1b7c   :  { %4341 = vadd.xlane.f32.xlu0 %v4340_v37 }
0x1b7d   :  { %v4337_v43 = vsel %vm55_vm0, %v4335_v40, 0.0 }
0x1b7e   :  { %4338 = vadd.xlane.f32.xlu1 %v4337_v43 }
0x1c05   :  { %v4342_v30 = vpop.xlane.xlu0 %4341 }
0x1c06   :  { %v4344_v12 = vmul.f32 0.03125, %v4342_v30 }
0x1c07   :  { %v4339_v44 = vpop.xlane.xlu1 %4338 }
0x1c08   :  { %v4346_v27 = vadd.f32 1e-05, %v4344_v12  ;;  %v4343_v45 = vmul.f32 0.03125, %v4339_v44 }
0x1c0a   :  { %4957 = vrsqrt.f32 %v4346_v27  ;;  %v4345_v46 = vadd.f32 1e-05, %v4343_v45 }
0x1c0c   :  { %4959 = vrsqrt.f32 %v4345_v46 }
0x1c17   :  { %v4958_v47 = vpop.eup %4957 }
0x1c18   :  { %v4350_v48 = vmul.f32 %v4958_v47, %v4334_v33 }
0x1c19   :  { %v4960_v49 = vpop.eup %4959 }
0x1c1a   :  { %v4349_v50 = vmul.f32 %v4960_v49, %v4333_v35  ;;  %v4352_v52 = vmul.f32 %v5533_v11, %v4350_v48 }
0x1c1c   :  { %v4351_v53 = vmul.f32 %v5533_v11, %v4349_v50  ;;  %v4354_v54 = vadd.f32 %v5539_v9, %v4352_v52 }
0x1c1e   :  { %v4353_v55 = vadd.f32 %v5539_v9, %v4351_v53  ;;  %4356 = vst.msk [vmem:[#allocation5 + $0x8] sm:$0xff] %vm55_vm0, %v4354_v54 }
0x1c20   :  { %4355 = vst.msk [vmem:[#allocation5] sm:$0xff] %vm55_vm0, %v4353_v55 }
0x1c21   :  { %4994 = shalt.err (!%p4991_p9)
}
0x1c22   :  { %4368 = dma.vmem_to_hbm [thread:$0]  %s4363_s23, 256, %s5587_s6, [#allocation4], %s5008_s24, %s5008_s24, %s5009_s25  }
0x1c23   :  { %5005 = dma.done.wait [#allocation4], 256  }
0x1c24   :  { %5006 = vsyncadd [#allocation4], 4294967040 }
0x1c25   :  { %4372 = vsyncpa [#allocation3], 1 }
0x1c26   :  { %4373 = vsyncpa [#allocation4], 1 }

</bundles_post_ra>
